<compile_context>
chip_gen: v5e
topology: v5e:2x2
jax: 0.10.0
libtpu: 0.0.40
codegen_flags: <defaults>
</compile_context>

<pallas_src>
import numpy as np
import jax
import jax.numpy as jnp
from jax.experimental import pallas as pl
from jax.experimental.pallas import tpu as pltpu

# ---------------- configuration (small synthetic shapes) ----------------
F_PTS = 8                 # number of fiducial points F
IN_C = 4
IN_H = IN_W = 16
OUT_H, OUT_W = 8, 16      # GridGenerator output_size
N_IN = IN_H * IN_W        # 256
N_OUT = OUT_H * OUT_W     # 128
C1, C2 = 8, 16            # conv channels of the synthetic feature extractor
HID = 32                  # hidden width of the STN head
EPS = 1e-6

assert N_IN & (N_IN - 1) == 0 and IN_W & (IN_W - 1) == 0
LOG2_NIN = N_IN.bit_length() - 1      # 8
LOG2_W = IN_W.bit_length() - 1        # 4

# -------- packed parameter slab layout (one DMA stream; 8-row-aligned regions) --------
ROW_FC2W = 0            # rows [ 0,32) cols [0,2F)     fc2 weight, columns reordered [x | y]
ROW_FC2B = 32           # row   32     cols [0,2F)     fc2 bias, reordered [x | y]
ROW_AT = 40             # rows [40,48) cols [0,128)    aT = ((P_hat @ inv_delta_C)[:, :F]).T
ROW_FC1W = 48           # rows [48,64) cols [0,HID)    fc1 weight (C2, HID)
ROW_FC1B = 64           # row   64     cols [0,HID)    fc1 bias
ROW_W1 = 72             # rows [72,80) cols [0,9*IN_C) conv1 im2col weight, col 9*IN_C = bias
ROW_W2 = 80             # rows [80,96) cols [0,9*C1)   conv2 im2col weight, col 9*C1  = bias
P_ROWS, P_COLS = 96, 128


# ------------- GridGenerator constant buffers (host, like __init__) -------------
def build_grid_generator_buffers(F, output_size, eps):
    out_h, out_w = output_size
    # _build_C
    ctrl_pts_x = np.linspace(-1.0, 1.0, int(F / 2))
    ctrl_pts_y_top = -1 * np.ones(int(F / 2))
    ctrl_pts_y_bottom = np.ones(int(F / 2))
    C = np.concatenate(
        [np.stack([ctrl_pts_x, ctrl_pts_y_top], axis=1),
         np.stack([ctrl_pts_x, ctrl_pts_y_bottom], axis=1)], axis=0)
    # _build_inv_delta_C
    hat_C = np.zeros((F, F), dtype=float)
    for i in range(F):
        for j in range(i, F):
            r = np.linalg.norm(C[i] - C[j])
            hat_C[i, j] = r
            hat_C[j, i] = r
    np.fill_diagonal(hat_C, 1)
    hat_C = (hat_C ** 2) * np.log(hat_C)
    delta_C = np.concatenate([
        np.concatenate([np.ones((F, 1)), C, hat_C], axis=1),
        np.concatenate([np.zeros((2, 3)), np.transpose(C)], axis=1),
        np.concatenate([np.zeros((1, 3)), np.ones((1, F))], axis=1)], axis=0)
    inv_delta_C = np.linalg.inv(delta_C)            # (F+3, F+3)
    # _build_P
    grid_x = (np.arange(-out_w, out_w, 2) + 1.0) / out_w
    grid_y = (np.arange(-out_h, out_h, 2) + 1.0) / out_h
    P = np.stack(np.meshgrid(grid_x, grid_y), axis=2).reshape([-1, 2])
    # _build_P_hat
    n = P.shape[0]
    P_tile = np.tile(np.expand_dims(P, axis=1), (1, F, 1))
    C_tile = np.expand_dims(C, axis=0)
    P_diff = P_tile - C_tile
    rbf_norm = np.linalg.norm(P_diff, ord=2, axis=2)
    rbf = np.square(rbf_norm) * np.log(rbf_norm + eps)
    P_hat = np.concatenate([np.ones((n, 1)), P, rbf], axis=1)   # (n, F+3)
    return inv_delta_C, P_hat


# ---------------- fused Pallas kernel ----------------
def fused_tps_stn_kernel(x_ref, p_ref, o_ref):
    # x_ref: (IN_C, Bt*N_IN)      Bt samples side by side on lanes, channels on sublanes
    # p_ref: (P_ROWS, P_COLS)     packed parameter slab (see pack_param_slab)
    # o_ref: (1, Bt*IN_C, N_OUT)  (sample, channel) on sublanes, output pixels on lanes
    L = x_ref.shape[1]
    bt = L // N_IN
    x = x_ref[...]                                              # (C, L)

    # ---- border-validity masks of the 9 taps of a 3x3 / pad=1 conv, built from iota ----
    pix = jax.lax.broadcasted_iota(jnp.int32, (1, L), 1)
    loc = jnp.bitwise_and(pix, N_IN - 1)                        # pixel index within its sample
    py = jnp.right_shift(loc, LOG2_W)
    px = jnp.bitwise_and(loc, IN_W - 1)

    def tap_valid(oy, ox):
        conds = []
        if oy < 0:
            conds.append(py >= -oy)
        if oy > 0:
            conds.append(py < IN_H - oy)
        if ox < 0:
            conds.append(px >= -ox)
        if ox > 0:
            conds.append(px < IN_W - ox)
        v = conds[0]
        for c in conds[1:]:
            v = jnp.logical_and(v, c)
        return v                                                # (1, L) bool

    # ---- 3x3 conv (pad=1) + ReLU as ONE im2col matmul per layer ----
    def conv3x3_relu(inp, w, b):
        taps = []
        for dy in range(3):
            for dx in range(3):
                oy, ox = dy - 1, dx - 1
                off = oy * IN_W + ox
                if off == 0:
                    taps.append(inp)
                else:
                    # t[:, p] = inp[:, (p + off) % L]; every wrapped lane (row / sample /
                    # array boundary) falls on a position the validity mask zeroes.
                    rolled = pltpu.roll(inp, (-off) % L, axis=1)
                    taps.append(jnp.where(tap_valid(oy, ox), rolled, 0.0))
        col = jnp.concatenate(taps, axis=0)                     # (9*Cin, L)
        y = jnp.dot(w, col, preferred_element_type=jnp.float32) + b
        return jnp.maximum(y, 0.0)

    w1 = p_ref[ROW_W1:ROW_W1 + C1, 0:9 * IN_C]                  # (C1, 36)
    b1 = p_ref[ROW_W1:ROW_W1 + C1, 9 * IN_C:9 * IN_C + 1]       # (C1, 1)
    w2 = p_ref[ROW_W2:ROW_W2 + C2, 0:9 * C1]                    # (C2, 72)
    b2 = p_ref[ROW_W2:ROW_W2 + C2, 9 * C1:9 * C1 + 1]           # (C2, 1)
    f1 = conv3x3_relu(x, w1, b1)                                # (C1, L)
    f2 = conv3x3_relu(f1, w2, b2)                               # (C2, L)

    # ---- AdaptiveAvgPool2d((1,1)): per-sample mean via one matmul (no f2 transpose) ----
    n_sel = max(bt, 8)                                          # keep lane dim non-degenerate
    samp_of_pix = jnp.right_shift(
        jax.lax.broadcasted_iota(jnp.int32, (L, n_sel), 0), LOG2_NIN)
    samp_id = jax.lax.broadcasted_iota(jnp.int32, (L, n_sel), 1)
    pool_sel = jnp.where(samp_of_pix == samp_id, 1.0 / N_IN, 0.0)        # (L, n_sel)
    pooled = jnp.dot(f2, pool_sel, preferred_element_type=jnp.float32)   # (C2, n_sel)
    pooled = pooled.T[:bt]                                      # (Bt, C2) -- only tiny relayout

    # ---- STN head: FC -> ReLU -> FC (fc2 columns pre-reordered to [x coords | y coords]) ----
    fc1_w = p_ref[ROW_FC1W:ROW_FC1W + C2, 0:HID]
    fc1_b = p_ref[ROW_FC1B:ROW_FC1B + 1, 0:HID]
    fc2_w = p_ref[ROW_FC2W:ROW_FC2W + HID, 0:2 * F_PTS]
    fc2_b = p_ref[ROW_FC2B:ROW_FC2B + 1, 0:2 * F_PTS]
    h = jnp.maximum(
        jnp.dot(pooled, fc1_w, preferred_element_type=jnp.float32) + fc1_b, 0.0)   # (Bt, HID)
    coords = jnp.dot(h, fc2_w, preferred_element_type=jnp.float32) + fc2_b          # (Bt, 2F)
    cx = coords[:, :F_PTS]
    cy = coords[:, F_PTS:]

    # ---- GridGenerator: P' = C' @ ((P_hat @ inv_delta_C)[:, :F]).T   (aT folded on host) ----
    aT = p_ref[ROW_AT:ROW_AT + F_PTS, 0:N_OUT]                  # (F, N_OUT)
    gx = jnp.dot(cx, aT, preferred_element_type=jnp.float32)    # (Bt, N_OUT)
    gy = jnp.dot(cy, aT, preferred_element_type=jnp.float32)    # (Bt, N_OUT)

    # ---- grid_sample(border, align_corners=True): dense bilinear gather matrix per sample ----
    wmax = float(IN_W - 1)
    hmax = float(IN_H - 1)
    col_ids = jax.lax.broadcasted_iota(jnp.int32, (IN_W, N_OUT), 0)      # (W, N_OUT)
    row_ids = jax.lax.broadcasted_iota(jnp.int32, (IN_H, N_OUT), 0)      # (H, N_OUT)

    outs = []
    for s in range(bt):
        ix = jnp.clip((gx[s:s + 1, :] + 1.0) * 0.5 * wmax, 0.0, wmax)    # (1, N_OUT)
        iy = jnp.clip((gy[s:s + 1, :] + 1.0) * 0.5 * hmax, 0.0, hmax)
        x0 = jnp.floor(ix)
        y0 = jnp.floor(iy)
        wx1 = ix - x0
        wy1 = iy - y0
        wx0 = 1.0 - wx1
        wy0 = 1.0 - wy1
        x0i = x0.astype(jnp.int32)
        y0i = y0.astype(jnp.int32)
        x1i = jnp.minimum(x0i + 1, IN_W - 1)
        y1i = jnp.minimum(y0i + 1, IN_H - 1)
        # separable one-hot weights (the clipped-border x0==x1 / y0==y1 case still sums to 1;
        # do NOT simplify to a single where).
        wxT = (jnp.where(col_ids == x0i, wx0, 0.0) +
               jnp.where(col_ids == x1i, wx1, 0.0))                       # (W, N_OUT)
        wyT = (jnp.where(row_ids == y0i, wy0, 0.0) +
               jnp.where(row_ids == y1i, wy1, 0.0))                       # (H, N_OUT)
        # dense bilinear matrix: w_full[py*W + px, q] = wyT[py, q] * wxT[px, q]
        w_full = (wyT[:, None, :] * wxT[None, :, :]).reshape(N_IN, N_OUT)  # (N_IN, N_OUT)
        xs = x[:, s * N_IN:(s + 1) * N_IN]                                 # (C, N_IN)
        outs.append(jnp.dot(xs, w_full, preferred_element_type=jnp.float32))  # (C, N_OUT)

    o_ref[0] = outs[0] if bt == 1 else jnp.concatenate(outs, axis=0)       # (Bt*C, N_OUT)


# ---------------- parameter packing (host side, constant-folded) ----------------
def pack_param_slab(params):
    slab = jnp.zeros((P_ROWS, P_COLS), jnp.float32)
    # fc2: interleaved (x,y) output columns -> [x block | y block]
    fc2w_r = jnp.concatenate([params['fc2_w'][:, 0::2], params['fc2_w'][:, 1::2]], axis=1)
    fc2b_r = jnp.concatenate([params['fc2_b'][:, 0::2], params['fc2_b'][:, 1::2]], axis=1)
    slab = slab.at[ROW_FC2W:ROW_FC2W + HID, 0:2 * F_PTS].set(fc2w_r)
    slab = slab.at[ROW_FC2B, 0:2 * F_PTS].set(fc2b_r[0])
    slab = slab.at[ROW_AT:ROW_AT + F_PTS, 0:N_OUT].set(params['a_t'])
    slab = slab.at[ROW_FC1W:ROW_FC1W + C2, 0:HID].set(params['fc1_w'])
    slab = slab.at[ROW_FC1B, 0:HID].set(params['fc1_b'][0])
    # conv weights packed for im2col: W[cout, k*Cin + cin] = w_hwio[k // 3, k % 3, cin, cout]
    w1p = jnp.transpose(params['conv1_w'].reshape(9, IN_C, C1), (2, 0, 1)).reshape(C1, 9 * IN_C)
    w2p = jnp.transpose(params['conv2_w'].reshape(9, C1, C2), (2, 0, 1)).reshape(C2, 9 * C1)
    slab = slab.at[ROW_W1:ROW_W1 + C1, 0:9 * IN_C].set(w1p)
    slab = slab.at[ROW_W1:ROW_W1 + C1, 9 * IN_C].set(params['conv1_b'])
    slab = slab.at[ROW_W2:ROW_W2 + C2, 0:9 * C1].set(w2p)
    slab = slab.at[ROW_W2:ROW_W2 + C2, 9 * C1].set(params['conv2_b'])
    return slab


# ---------------- wrapper ----------------
def tps_stn_forward(x_nchw, params, num_batch_tiles=None):
    B, C, H, W = x_nchw.shape
    assert (C, H, W) == (IN_C, IN_H, IN_W)
    if num_batch_tiles is None:
        # 2 grid steps keep both v7x TensorCores busy; on single-TC v5e/v6e pass
        # num_batch_tiles=1 to fold the whole batch into one program.
        num_batch_tiles = 2 if B >= 2 else 1
    bt = -(-B // num_batch_tiles)                   # samples per program
    b_pad = bt * num_batch_tiles

    x = x_nchw.astype(jnp.float32)
    if b_pad != B:
        x = jnp.concatenate([x, jnp.zeros((b_pad - B, C, H, W), jnp.float32)], axis=0)
    # channels on sublanes, (sample, pixel) on lanes: x_cn[c, b*HW + p] = x[b, c, p]
    x_cn = jnp.transpose(x.reshape(b_pad, C, H * W), (1, 0, 2)).reshape(C, b_pad * H * W)

    out = pl.pallas_call(
        fused_tps_stn_kernel,
        out_shape=jax.ShapeDtypeStruct((num_batch_tiles, bt * C, N_OUT), jnp.float32),
        grid=(num_batch_tiles,),
        in_specs=[
            pl.BlockSpec((C, bt * N_IN), lambda t: (0, t)),
            pl.BlockSpec((P_ROWS, P_COLS), lambda t: (0, 0)),
        ],
        out_specs=pl.BlockSpec((1, bt * C, N_OUT), lambda t: (t, 0, 0)),
        compiler_params=pltpu.CompilerParams(dimension_semantics=("parallel",)),
    )(x_cn, params['slab'])

    out = out.reshape(b_pad, C, OUT_H, OUT_W)       # rows are already (sample, channel) ordered
    return out[:B]


# ---------------- parameters (deterministic, synthetic) ----------------
def init_params():
    key = jax.random.PRNGKey(0)
    k1, k2, k3 = jax.random.split(key, 3)
    params = {}
    params['conv1_w'] = 0.1 * jax.random.normal(k1, (3, 3, IN_C, C1), jnp.float32)
    params['conv1_b'] = jnp.zeros((C1,), jnp.float32)
    params['conv2_w'] = 0.1 * jax.random.normal(k2, (3, 3, C1, C2), jnp.float32)
    params['conv2_b'] = jnp.zeros((C2,), jnp.float32)
    params['fc1_w'] = 0.1 * jax.random.normal(k3, (C2, HID), jnp.float32)
    params['fc1_b'] = jnp.zeros((1, HID), jnp.float32)
    # last FC: weight filled with 0, bias = initial fiducial points (RARE Fig. 6(a))
    params['fc2_w'] = jnp.zeros((HID, 2 * F_PTS), jnp.float32)
    half = F_PTS // 2
    ctrl_pts_x = np.linspace(-1.0, 1.0, half)
    ctrl_pts_y_top = np.linspace(0.0, -1.0, num=half)
    ctrl_pts_y_bottom = np.linspace(1.0, 0.0, num=half)
    initial_bias = np.concatenate(
        [np.stack([ctrl_pts_x, ctrl_pts_y_top], axis=1),
         np.stack([ctrl_pts_x, ctrl_pts_y_bottom], axis=1)], axis=0).reshape(-1)
    params['fc2_b'] = jnp.asarray(initial_bias, jnp.float32).reshape(1, 2 * F_PTS)

    inv_delta_C, P_hat = build_grid_generator_buffers(F_PTS, (OUT_H, OUT_W), EPS)
    params['inv_delta_C'] = jnp.asarray(inv_delta_C, jnp.float32)
    params['P_hat'] = jnp.asarray(P_hat, jnp.float32)
    A = P_hat @ inv_delta_C                                   # (N_out, F+3)
    params['a_t'] = jnp.asarray(A[:, :F_PTS].T, jnp.float32)  # (F, N_out)
    params['slab'] = pack_param_slab(params)                  # single packed DMA stream
    return params


# ---------------- pure-JAX reference (for in-script validation) ----------------
def tps_stn_reference(x_nchw, params):
    hp = jax.lax.Precision.HIGHEST
    x = x_nchw.astype(jnp.float32)
    B = x.shape[0]
    xh = jnp.transpose(x, (0, 2, 3, 1))                       # NHWC

    def conv(inp, w, b):
        y = jax.lax.conv_general_dilated(
            inp, w, window_strides=(1, 1), padding='SAME',
            dimension_numbers=('NHWC', 'HWIO', 'NHWC'), precision=hp)
        return jnp.maximum(y + b, 0.0)

    f1 = conv(xh, params['conv1_w'], params['conv1_b'])
    f2 = conv(f1, params['conv2_w'], params['conv2_b'])
    pooled = jnp.mean(f2, axis=(1, 2))                        # (B, C2)
    h = jnp.maximum(jnp.dot(pooled, params['fc1_w'], precision=hp)
                    + params['fc1_b'], 0.0)
    cpr = (jnp.dot(h, params['fc2_w'], precision=hp)
           + params['fc2_b']).reshape(B, F_PTS, 2)
    cpz = jnp.concatenate([cpr, jnp.zeros((B, 3, 2), jnp.float32)], axis=1)
    T = jnp.einsum('ij,bjk->bik', params['inv_delta_C'], cpz, precision=hp)
    P_prime = jnp.einsum('nj,bjk->bnk', params['P_hat'], T, precision=hp)
    gx, gy = P_prime[..., 0], P_prime[..., 1]
    ix = jnp.clip((gx + 1.0) * 0.5 * (IN_W - 1), 0.0, IN_W - 1)
    iy = jnp.clip((gy + 1.0) * 0.5 * (IN_H - 1), 0.0, IN_H - 1)
    x0 = jnp.floor(ix)
    y0 = jnp.floor(iy)
    x0i = x0.astype(jnp.int32)
    y0i = y0.astype(jnp.int32)
    x1i = jnp.minimum(x0i + 1, IN_W - 1)
    y1i = jnp.minimum(y0i + 1, IN_H - 1)
    wx1 = ix - x0
    wy1 = iy - y0
    wx0 = 1.0 - wx1
    wy0 = 1.0 - wy1

    def g(img, yi, xi):
        return img[:, yi, xi]                                 # (C, N)

    outs = []
    for b in range(B):
        img = x[b]
        o = (g(img, y0i[b], x0i[b]) * (wy0[b] * wx0[b])[None, :]
             + g(img, y0i[b], x1i[b]) * (wy0[b] * wx1[b])[None, :]
             + g(img, y1i[b], x0i[b]) * (wy1[b] * wx0[b])[None, :]
             + g(img, y1i[b], x1i[b]) * (wy1[b] * wx1[b])[None, :])
        outs.append(o.reshape(IN_C, OUT_H, OUT_W))
    return jnp.stack(outs, axis=0)


if __name__ == "__main__":
    params = init_params()
    x = jax.random.normal(jax.random.PRNGKey(0), (2, IN_C, IN_H, IN_W), jnp.float32)

    fwd = jax.jit(lambda inp: tps_stn_forward(inp, params))
    out = jax.block_until_ready(fwd(x))
    assert out.shape == (2, IN_C, OUT_H, OUT_W), out.shape
    assert bool(jnp.all(jnp.isfinite(out)))

    ref = jax.jit(lambda inp: tps_stn_reference(inp, params))
    ref_out = jax.block_until_ready(ref(x))
    np.testing.assert_allclose(np.asarray(out), np.asarray(ref_out),
                               rtol=2e-3, atol=2e-3)
    print("KERNEL_OK")
</pallas_src>

<mosaic_0001>
module attributes {stable_mosaic.version = 11 : i64} {
  func.func @fused_tps_stn_kernel(%arg0: i32, %arg1: memref<4x256xf32, #tpu.memory_space<vmem>>, %arg2: memref<96x128xf32, #tpu.memory_space<vmem>>, %arg3: memref<1x4x128xf32, #tpu.memory_space<vmem>>) attributes {dimension_semantics = [#tpu.dimension_semantics<parallel>], iteration_bounds = array<i64: 2>, scalar_prefetch = 0 : i64, scratch_operands = 0 : i64, tpu.core_type = #tpu.core_type<tc>, window_params = [{transform_indices = @transform_0, window_bounds = array<i64: 4, 256>}, {pipeline_mode = #tpu.pipeline_mode<synchronous>, transform_indices = @transform_1, window_bounds = array<i64: 96, 128>}, {transform_indices = @transform_2, window_bounds = array<i64: 1, 4, 128>}]} {
    %c0 = arith.constant 0 : index
    %c0_0 = arith.constant 0 : index
    %0 = vector.load %arg1[%c0, %c0_0] : memref<4x256xf32, #tpu.memory_space<vmem>>, vector<4x256xf32>
    %1 = tpu.iota {dimensions = array<i32: 1>} : vector<1x256xi32>
    %c255_i32 = arith.constant 255 : i32
    %2 = vector.broadcast %c255_i32 : i32 to vector<1x256xi32>
    %3 = arith.andi %1, %2 : vector<1x256xi32>
    %c4_i32 = arith.constant 4 : i32
    %4 = vector.broadcast %c4_i32 : i32 to vector<1x256xi32>
    %5 = arith.shrsi %3, %4 : vector<1x256xi32>
    %c15_i32 = arith.constant 15 : i32
    %6 = vector.broadcast %c15_i32 : i32 to vector<1x256xi32>
    %7 = arith.andi %3, %6 : vector<1x256xi32>
    %c72 = arith.constant 72 : index
    %c0_1 = arith.constant 0 : index
    %8 = vector.load %arg2[%c72, %c0_1] : memref<96x128xf32, #tpu.memory_space<vmem>>, vector<8x36xf32>
    %c72_2 = arith.constant 72 : index
    %c36 = arith.constant 36 : index
    %9 = vector.load %arg2[%c72_2, %c36] : memref<96x128xf32, #tpu.memory_space<vmem>>, vector<8x1xf32>
    %c80 = arith.constant 80 : index
    %c0_3 = arith.constant 0 : index
    %10 = vector.load %arg2[%c80, %c0_3] : memref<96x128xf32, #tpu.memory_space<vmem>>, vector<16x72xf32>
    %c80_4 = arith.constant 80 : index
    %c72_5 = arith.constant 72 : index
    %11 = vector.load %arg2[%c80_4, %c72_5] : memref<96x128xf32, #tpu.memory_space<vmem>>, vector<16x1xf32>
    %c17_i32 = arith.constant 17 : i32
    %12 = tpu.dynamic_rotate %0 by %c17_i32 dim 1 : vector<4x256xf32>, i32 -> vector<4x256xf32>
    %c1_i32 = arith.constant 1 : i32
    %13 = vector.broadcast %c1_i32 : i32 to vector<1x256xi32>
    %14 = arith.cmpi sge, %5, %13 : vector<1x256xi32>
    %c1_i32_6 = arith.constant 1 : i32
    %15 = vector.broadcast %c1_i32_6 : i32 to vector<1x256xi32>
    %16 = arith.cmpi sge, %7, %15 : vector<1x256xi32>
    %17 = arith.andi %14, %16 : vector<1x256xi1>
    %cst = arith.constant 0.000000e+00 : f32
    %18 = vector.shape_cast %17 : vector<1x256xi1> to vector<1x256xi1>
    %19 = vector.broadcast %18 : vector<1x256xi1> to vector<4x256xi1>
    %20 = vector.broadcast %cst : f32 to vector<4x256xf32>
    %21 = arith.select %19, %12, %20 : vector<4x256xi1>, vector<4x256xf32>
    %c16_i32 = arith.constant 16 : i32
    %22 = tpu.dynamic_rotate %0 by %c16_i32 dim 1 : vector<4x256xf32>, i32 -> vector<4x256xf32>
    %c1_i32_7 = arith.constant 1 : i32
    %23 = vector.broadcast %c1_i32_7 : i32 to vector<1x256xi32>
    %24 = arith.cmpi sge, %5, %23 : vector<1x256xi32>
    %cst_8 = arith.constant 0.000000e+00 : f32
    %25 = vector.shape_cast %24 : vector<1x256xi1> to vector<1x256xi1>
    %26 = vector.broadcast %25 : vector<1x256xi1> to vector<4x256xi1>
    %27 = vector.broadcast %cst_8 : f32 to vector<4x256xf32>
    %28 = arith.select %26, %22, %27 : vector<4x256xi1>, vector<4x256xf32>
    %c15_i32_9 = arith.constant 15 : i32
    %29 = tpu.dynamic_rotate %0 by %c15_i32_9 dim 1 : vector<4x256xf32>, i32 -> vector<4x256xf32>
    %c1_i32_10 = arith.constant 1 : i32
    %30 = vector.broadcast %c1_i32_10 : i32 to vector<1x256xi32>
    %31 = arith.cmpi sge, %5, %30 : vector<1x256xi32>
    %c15_i32_11 = arith.constant 15 : i32
    %32 = vector.broadcast %c15_i32_11 : i32 to vector<1x256xi32>
    %33 = arith.cmpi slt, %7, %32 : vector<1x256xi32>
    %34 = arith.andi %31, %33 : vector<1x256xi1>
    %cst_12 = arith.constant 0.000000e+00 : f32
    %35 = vector.shape_cast %34 : vector<1x256xi1> to vector<1x256xi1>
    %36 = vector.broadcast %35 : vector<1x256xi1> to vector<4x256xi1>
    %37 = vector.broadcast %cst_12 : f32 to vector<4x256xf32>
    %38 = arith.select %36, %29, %37 : vector<4x256xi1>, vector<4x256xf32>
    %c1_i32_13 = arith.constant 1 : i32
    %39 = tpu.dynamic_rotate %0 by %c1_i32_13 dim 1 : vector<4x256xf32>, i32 -> vector<4x256xf32>
    %c1_i32_14 = arith.constant 1 : i32
    %40 = vector.broadcast %c1_i32_14 : i32 to vector<1x256xi32>
    %41 = arith.cmpi sge, %7, %40 : vector<1x256xi32>
    %cst_15 = arith.constant 0.000000e+00 : f32
    %42 = vector.shape_cast %41 : vector<1x256xi1> to vector<1x256xi1>
    %43 = vector.broadcast %42 : vector<1x256xi1> to vector<4x256xi1>
    %44 = vector.broadcast %cst_15 : f32 to vector<4x256xf32>
    %45 = arith.select %43, %39, %44 : vector<4x256xi1>, vector<4x256xf32>
    %c255_i32_16 = arith.constant 255 : i32
    %46 = tpu.dynamic_rotate %0 by %c255_i32_16 dim 1 : vector<4x256xf32>, i32 -> vector<4x256xf32>
    %c15_i32_17 = arith.constant 15 : i32
    %47 = vector.broadcast %c15_i32_17 : i32 to vector<1x256xi32>
    %48 = arith.cmpi slt, %7, %47 : vector<1x256xi32>
    %cst_18 = arith.constant 0.000000e+00 : f32
    %49 = vector.shape_cast %48 : vector<1x256xi1> to vector<1x256xi1>
    %50 = vector.broadcast %49 : vector<1x256xi1> to vector<4x256xi1>
    %51 = vector.broadcast %cst_18 : f32 to vector<4x256xf32>
    %52 = arith.select %50, %46, %51 : vector<4x256xi1>, vector<4x256xf32>
    %c241_i32 = arith.constant 241 : i32
    %53 = tpu.dynamic_rotate %0 by %c241_i32 dim 1 : vector<4x256xf32>, i32 -> vector<4x256xf32>
    %c15_i32_19 = arith.constant 15 : i32
    %54 = vector.broadcast %c15_i32_19 : i32 to vector<1x256xi32>
    %55 = arith.cmpi slt, %5, %54 : vector<1x256xi32>
    %c1_i32_20 = arith.constant 1 : i32
    %56 = vector.broadcast %c1_i32_20 : i32 to vector<1x256xi32>
    %57 = arith.cmpi sge, %7, %56 : vector<1x256xi32>
    %58 = arith.andi %55, %57 : vector<1x256xi1>
    %cst_21 = arith.constant 0.000000e+00 : f32
    %59 = vector.shape_cast %58 : vector<1x256xi1> to vector<1x256xi1>
    %60 = vector.broadcast %59 : vector<1x256xi1> to vector<4x256xi1>
    %61 = vector.broadcast %cst_21 : f32 to vector<4x256xf32>
    %62 = arith.select %60, %53, %61 : vector<4x256xi1>, vector<4x256xf32>
    %c240_i32 = arith.constant 240 : i32
    %63 = tpu.dynamic_rotate %0 by %c240_i32 dim 1 : vector<4x256xf32>, i32 -> vector<4x256xf32>
    %c15_i32_22 = arith.constant 15 : i32
    %64 = vector.broadcast %c15_i32_22 : i32 to vector<1x256xi32>
    %65 = arith.cmpi slt, %5, %64 : vector<1x256xi32>
    %cst_23 = arith.constant 0.000000e+00 : f32
    %66 = vector.shape_cast %65 : vector<1x256xi1> to vector<1x256xi1>
    %67 = vector.broadcast %66 : vector<1x256xi1> to vector<4x256xi1>
    %68 = vector.broadcast %cst_23 : f32 to vector<4x256xf32>
    %69 = arith.select %67, %63, %68 : vector<4x256xi1>, vector<4x256xf32>
    %c239_i32 = arith.constant 239 : i32
    %70 = tpu.dynamic_rotate %0 by %c239_i32 dim 1 : vector<4x256xf32>, i32 -> vector<4x256xf32>
    %c15_i32_24 = arith.constant 15 : i32
    %71 = vector.broadcast %c15_i32_24 : i32 to vector<1x256xi32>
    %72 = arith.cmpi slt, %5, %71 : vector<1x256xi32>
    %c15_i32_25 = arith.constant 15 : i32
    %73 = vector.broadcast %c15_i32_25 : i32 to vector<1x256xi32>
    %74 = arith.cmpi slt, %7, %73 : vector<1x256xi32>
    %75 = arith.andi %72, %74 : vector<1x256xi1>
    %cst_26 = arith.constant 0.000000e+00 : f32
    %76 = vector.shape_cast %75 : vector<1x256xi1> to vector<1x256xi1>
    %77 = vector.broadcast %76 : vector<1x256xi1> to vector<4x256xi1>
    %78 = vector.broadcast %cst_26 : f32 to vector<4x256xf32>
    %79 = arith.select %77, %70, %78 : vector<4x256xi1>, vector<4x256xf32>
    %80 = tpu.concatenate %21, %28, %38, %45, %0, %52, %62, %69, %79 in 0 : vector<4x256xf32>, vector<4x256xf32>, vector<4x256xf32>, vector<4x256xf32>, vector<4x256xf32>, vector<4x256xf32>, vector<4x256xf32>, vector<4x256xf32>, vector<4x256xf32> -> vector<36x256xf32>
    %cst_27 = arith.constant dense<0.000000e+00> : vector<8x256xf32>
    %81 = tpu.matmul %8, %80, %cst_27 {dimension_numbers = #tpu.dot_dimension_numbers<[1], [0], [0], [1], [0, 0, 1, 1], [], []>} : vector<8x36xf32>, vector<36x256xf32>, vector<8x256xf32> -> vector<8x256xf32>
    %82 = vector.broadcast %9 : vector<8x1xf32> to vector<8x256xf32>
    %83 = arith.addf %81, %82 : vector<8x256xf32>
    %cst_28 = arith.constant 0.000000e+00 : f32
    %84 = vector.broadcast %cst_28 : f32 to vector<8x256xf32>
    %85 = arith.maximumf %83, %84 : vector<8x256xf32>
    %c17_i32_29 = arith.constant 17 : i32
    %86 = tpu.dynamic_rotate %85 by %c17_i32_29 dim 1 : vector<8x256xf32>, i32 -> vector<8x256xf32>
    %c1_i32_30 = arith.constant 1 : i32
    %87 = vector.broadcast %c1_i32_30 : i32 to vector<1x256xi32>
    %88 = arith.cmpi sge, %5, %87 : vector<1x256xi32>
    %c1_i32_31 = arith.constant 1 : i32
    %89 = vector.broadcast %c1_i32_31 : i32 to vector<1x256xi32>
    %90 = arith.cmpi sge, %7, %89 : vector<1x256xi32>
    %91 = arith.andi %88, %90 : vector<1x256xi1>
    %cst_32 = arith.constant 0.000000e+00 : f32
    %92 = vector.shape_cast %91 : vector<1x256xi1> to vector<1x256xi1>
    %93 = vector.broadcast %92 : vector<1x256xi1> to vector<8x256xi1>
    %94 = vector.broadcast %cst_32 : f32 to vector<8x256xf32>
    %95 = arith.select %93, %86, %94 : vector<8x256xi1>, vector<8x256xf32>
    %c16_i32_33 = arith.constant 16 : i32
    %96 = tpu.dynamic_rotate %85 by %c16_i32_33 dim 1 : vector<8x256xf32>, i32 -> vector<8x256xf32>
    %c1_i32_34 = arith.constant 1 : i32
    %97 = vector.broadcast %c1_i32_34 : i32 to vector<1x256xi32>
    %98 = arith.cmpi sge, %5, %97 : vector<1x256xi32>
    %cst_35 = arith.constant 0.000000e+00 : f32
    %99 = vector.shape_cast %98 : vector<1x256xi1> to vector<1x256xi1>
    %100 = vector.broadcast %99 : vector<1x256xi1> to vector<8x256xi1>
    %101 = vector.broadcast %cst_35 : f32 to vector<8x256xf32>
    %102 = arith.select %100, %96, %101 : vector<8x256xi1>, vector<8x256xf32>
    %c15_i32_36 = arith.constant 15 : i32
    %103 = tpu.dynamic_rotate %85 by %c15_i32_36 dim 1 : vector<8x256xf32>, i32 -> vector<8x256xf32>
    %c1_i32_37 = arith.constant 1 : i32
    %104 = vector.broadcast %c1_i32_37 : i32 to vector<1x256xi32>
    %105 = arith.cmpi sge, %5, %104 : vector<1x256xi32>
    %c15_i32_38 = arith.constant 15 : i32
    %106 = vector.broadcast %c15_i32_38 : i32 to vector<1x256xi32>
    %107 = arith.cmpi slt, %7, %106 : vector<1x256xi32>
    %108 = arith.andi %105, %107 : vector<1x256xi1>
    %cst_39 = arith.constant 0.000000e+00 : f32
    %109 = vector.shape_cast %108 : vector<1x256xi1> to vector<1x256xi1>
    %110 = vector.broadcast %109 : vector<1x256xi1> to vector<8x256xi1>
    %111 = vector.broadcast %cst_39 : f32 to vector<8x256xf32>
    %112 = arith.select %110, %103, %111 : vector<8x256xi1>, vector<8x256xf32>
    %c1_i32_40 = arith.constant 1 : i32
    %113 = tpu.dynamic_rotate %85 by %c1_i32_40 dim 1 : vector<8x256xf32>, i32 -> vector<8x256xf32>
    %c1_i32_41 = arith.constant 1 : i32
    %114 = vector.broadcast %c1_i32_41 : i32 to vector<1x256xi32>
    %115 = arith.cmpi sge, %7, %114 : vector<1x256xi32>
    %cst_42 = arith.constant 0.000000e+00 : f32
    %116 = vector.shape_cast %115 : vector<1x256xi1> to vector<1x256xi1>
    %117 = vector.broadcast %116 : vector<1x256xi1> to vector<8x256xi1>
    %118 = vector.broadcast %cst_42 : f32 to vector<8x256xf32>
    %119 = arith.select %117, %113, %118 : vector<8x256xi1>, vector<8x256xf32>
    %c255_i32_43 = arith.constant 255 : i32
    %120 = tpu.dynamic_rotate %85 by %c255_i32_43 dim 1 : vector<8x256xf32>, i32 -> vector<8x256xf32>
    %c15_i32_44 = arith.constant 15 : i32
    %121 = vector.broadcast %c15_i32_44 : i32 to vector<1x256xi32>
    %122 = arith.cmpi slt, %7, %121 : vector<1x256xi32>
    %cst_45 = arith.constant 0.000000e+00 : f32
    %123 = vector.shape_cast %122 : vector<1x256xi1> to vector<1x256xi1>
    %124 = vector.broadcast %123 : vector<1x256xi1> to vector<8x256xi1>
    %125 = vector.broadcast %cst_45 : f32 to vector<8x256xf32>
    %126 = arith.select %124, %120, %125 : vector<8x256xi1>, vector<8x256xf32>
    %c241_i32_46 = arith.constant 241 : i32
    %127 = tpu.dynamic_rotate %85 by %c241_i32_46 dim 1 : vector<8x256xf32>, i32 -> vector<8x256xf32>
    %c15_i32_47 = arith.constant 15 : i32
    %128 = vector.broadcast %c15_i32_47 : i32 to vector<1x256xi32>
    %129 = arith.cmpi slt, %5, %128 : vector<1x256xi32>
    %c1_i32_48 = arith.constant 1 : i32
    %130 = vector.broadcast %c1_i32_48 : i32 to vector<1x256xi32>
    %131 = arith.cmpi sge, %7, %130 : vector<1x256xi32>
    %132 = arith.andi %129, %131 : vector<1x256xi1>
    %cst_49 = arith.constant 0.000000e+00 : f32
    %133 = vector.shape_cast %132 : vector<1x256xi1> to vector<1x256xi1>
    %134 = vector.broadcast %133 : vector<1x256xi1> to vector<8x256xi1>
    %135 = vector.broadcast %cst_49 : f32 to vector<8x256xf32>
    %136 = arith.select %134, %127, %135 : vector<8x256xi1>, vector<8x256xf32>
    %c240_i32_50 = arith.constant 240 : i32
    %137 = tpu.dynamic_rotate %85 by %c240_i32_50 dim 1 : vector<8x256xf32>, i32 -> vector<8x256xf32>
    %c15_i32_51 = arith.constant 15 : i32
    %138 = vector.broadcast %c15_i32_51 : i32 to vector<1x256xi32>
    %139 = arith.cmpi slt, %5, %138 : vector<1x256xi32>
    %cst_52 = arith.constant 0.000000e+00 : f32
    %140 = vector.shape_cast %139 : vector<1x256xi1> to vector<1x256xi1>
    %141 = vector.broadcast %140 : vector<1x256xi1> to vector<8x256xi1>
    %142 = vector.broadcast %cst_52 : f32 to vector<8x256xf32>
    %143 = arith.select %141, %137, %142 : vector<8x256xi1>, vector<8x256xf32>
    %c239_i32_53 = arith.constant 239 : i32
    %144 = tpu.dynamic_rotate %85 by %c239_i32_53 dim 1 : vector<8x256xf32>, i32 -> vector<8x256xf32>
    %c15_i32_54 = arith.constant 15 : i32
    %145 = vector.broadcast %c15_i32_54 : i32 to vector<1x256xi32>
    %146 = arith.cmpi slt, %5, %145 : vector<1x256xi32>
    %c15_i32_55 = arith.constant 15 : i32
    %147 = vector.broadcast %c15_i32_55 : i32 to vector<1x256xi32>
    %148 = arith.cmpi slt, %7, %147 : vector<1x256xi32>
    %149 = arith.andi %146, %148 : vector<1x256xi1>
    %cst_56 = arith.constant 0.000000e+00 : f32
    %150 = vector.shape_cast %149 : vector<1x256xi1> to vector<1x256xi1>
    %151 = vector.broadcast %150 : vector<1x256xi1> to vector<8x256xi1>
    %152 = vector.broadcast %cst_56 : f32 to vector<8x256xf32>
    %153 = arith.select %151, %144, %152 : vector<8x256xi1>, vector<8x256xf32>
    %154 = tpu.concatenate %95, %102, %112, %119, %85, %126, %136, %143, %153 in 0 : vector<8x256xf32>, vector<8x256xf32>, vector<8x256xf32>, vector<8x256xf32>, vector<8x256xf32>, vector<8x256xf32>, vector<8x256xf32>, vector<8x256xf32>, vector<8x256xf32> -> vector<72x256xf32>
    %cst_57 = arith.constant dense<0.000000e+00> : vector<16x256xf32>
    %155 = tpu.matmul %10, %154, %cst_57 {dimension_numbers = #tpu.dot_dimension_numbers<[1], [0], [0], [1], [0, 0, 1, 1], [], []>} : vector<16x72xf32>, vector<72x256xf32>, vector<16x256xf32> -> vector<16x256xf32>
    %156 = vector.broadcast %11 : vector<16x1xf32> to vector<16x256xf32>
    %157 = arith.addf %155, %156 : vector<16x256xf32>
    %cst_58 = arith.constant 0.000000e+00 : f32
    %158 = vector.broadcast %cst_58 : f32 to vector<16x256xf32>
    %159 = arith.maximumf %157, %158 : vector<16x256xf32>
    %160 = tpu.iota {dimensions = array<i32: 0>} : vector<256x8xi32>
    %c8_i32 = arith.constant 8 : i32
    %161 = vector.broadcast %c8_i32 : i32 to vector<256x8xi32>
    %162 = arith.shrsi %160, %161 : vector<256x8xi32>
    %163 = tpu.iota {dimensions = array<i32: 1>} : vector<256x8xi32>
    %164 = arith.cmpi eq, %162, %163 : vector<256x8xi32>
    %cst_59 = arith.constant 3.906250e-03 : f32
    %cst_60 = arith.constant 0.000000e+00 : f32
    %165 = vector.broadcast %cst_59 : f32 to vector<256x8xf32>
    %166 = vector.broadcast %cst_60 : f32 to vector<256x8xf32>
    %167 = arith.select %164, %165, %166 : vector<256x8xi1>, vector<256x8xf32>
    %cst_61 = arith.constant dense<0.000000e+00> : vector<16x8xf32>
    %168 = tpu.matmul %159, %167, %cst_61 {dimension_numbers = #tpu.dot_dimension_numbers<[1], [0], [0], [1], [0, 0, 1, 1], [], []>} : vector<16x256xf32>, vector<256x8xf32>, vector<16x8xf32> -> vector<16x8xf32>
    %169 = tpu.transpose %168, [1, 0] : vector<16x8xf32> -> vector<8x16xf32>
    %170 = vector.extract_strided_slice %169 {offsets = [0, 0], sizes = [1, 16], strides = [1, 1]} : vector<8x16xf32> to vector<1x16xf32>
    %c48 = arith.constant 48 : index
    %c0_62 = arith.constant 0 : index
    %171 = vector.load %arg2[%c48, %c0_62] : memref<96x128xf32, #tpu.memory_space<vmem>>, vector<16x32xf32>
    %c64 = arith.constant 64 : index
    %c0_63 = arith.constant 0 : index
    %172 = vector.load %arg2[%c64, %c0_63] : memref<96x128xf32, #tpu.memory_space<vmem>>, vector<1x32xf32>
    %c0_64 = arith.constant 0 : index
    %c0_65 = arith.constant 0 : index
    %173 = vector.load %arg2[%c0_64, %c0_65] : memref<96x128xf32, #tpu.memory_space<vmem>>, vector<32x16xf32>
    %c32 = arith.constant 32 : index
    %c0_66 = arith.constant 0 : index
    %174 = vector.load %arg2[%c32, %c0_66] : memref<96x128xf32, #tpu.memory_space<vmem>>, vector<1x16xf32>
    %cst_67 = arith.constant dense<0.000000e+00> : vector<1x32xf32>
    %175 = tpu.matmul %170, %171, %cst_67 {dimension_numbers = #tpu.dot_dimension_numbers<[1], [0], [0], [1], [0, 0, 1, 1], [], []>} : vector<1x16xf32>, vector<16x32xf32>, vector<1x32xf32> -> vector<1x32xf32>
    %176 = arith.addf %175, %172 : vector<1x32xf32>
    %cst_68 = arith.constant 0.000000e+00 : f32
    %177 = vector.broadcast %cst_68 : f32 to vector<1x32xf32>
    %178 = arith.maximumf %176, %177 : vector<1x32xf32>
    %cst_69 = arith.constant dense<0.000000e+00> : vector<1x16xf32>
    %179 = tpu.matmul %178, %173, %cst_69 {dimension_numbers = #tpu.dot_dimension_numbers<[1], [0], [0], [1], [0, 0, 1, 1], [], []>} : vector<1x32xf32>, vector<32x16xf32>, vector<1x16xf32> -> vector<1x16xf32>
    %180 = arith.addf %179, %174 : vector<1x16xf32>
    %181 = vector.extract_strided_slice %180 {offsets = [0, 0], sizes = [1, 8], strides = [1, 1]} : vector<1x16xf32> to vector<1x8xf32>
    %182 = vector.extract_strided_slice %180 {offsets = [0, 8], sizes = [1, 8], strides = [1, 1]} : vector<1x16xf32> to vector<1x8xf32>
    %c40 = arith.constant 40 : index
    %c0_70 = arith.constant 0 : index
    %183 = vector.load %arg2[%c40, %c0_70] : memref<96x128xf32, #tpu.memory_space<vmem>>, vector<8x128xf32>
    %cst_71 = arith.constant dense<0.000000e+00> : vector<1x128xf32>
    %184 = tpu.matmul %181, %183, %cst_71 {dimension_numbers = #tpu.dot_dimension_numbers<[1], [0], [0], [1], [0, 0, 1, 1], [], []>} : vector<1x8xf32>, vector<8x128xf32>, vector<1x128xf32> -> vector<1x128xf32>
    %cst_72 = arith.constant dense<0.000000e+00> : vector<1x128xf32>
    %185 = tpu.matmul %182, %183, %cst_72 {dimension_numbers = #tpu.dot_dimension_numbers<[1], [0], [0], [1], [0, 0, 1, 1], [], []>} : vector<1x8xf32>, vector<8x128xf32>, vector<1x128xf32> -> vector<1x128xf32>
    %186 = tpu.iota {dimensions = array<i32: 0>} : vector<16x128xi32>
    %187 = tpu.iota {dimensions = array<i32: 0>} : vector<16x128xi32>
    %cst_73 = arith.constant 1.000000e+00 : f32
    %188 = vector.broadcast %cst_73 : f32 to vector<1x128xf32>
    %189 = arith.addf %184, %188 : vector<1x128xf32>
    %cst_74 = arith.constant 5.000000e-01 : f32
    %190 = vector.broadcast %cst_74 : f32 to vector<1x128xf32>
    %191 = arith.mulf %189, %190 : vector<1x128xf32>
    %cst_75 = arith.constant 1.500000e+01 : f32
    %192 = vector.broadcast %cst_75 : f32 to vector<1x128xf32>
    %193 = arith.mulf %191, %192 : vector<1x128xf32>
    %cst_76 = arith.constant 0.000000e+00 : f32
    %cst_77 = arith.constant 1.500000e+01 : f32
    %194 = vector.broadcast %cst_76 : f32 to vector<1x128xf32>
    %195 = arith.maximumf %194, %193 : vector<1x128xf32>
    %196 = vector.broadcast %cst_77 : f32 to vector<1x128xf32>
    %197 = arith.minimumf %196, %195 : vector<1x128xf32>
    %cst_78 = arith.constant 1.000000e+00 : f32
    %198 = vector.broadcast %cst_78 : f32 to vector<1x128xf32>
    %199 = arith.addf %185, %198 : vector<1x128xf32>
    %cst_79 = arith.constant 5.000000e-01 : f32
    %200 = vector.broadcast %cst_79 : f32 to vector<1x128xf32>
    %201 = arith.mulf %199, %200 : vector<1x128xf32>
    %cst_80 = arith.constant 1.500000e+01 : f32
    %202 = vector.broadcast %cst_80 : f32 to vector<1x128xf32>
    %203 = arith.mulf %201, %202 : vector<1x128xf32>
    %cst_81 = arith.constant 0.000000e+00 : f32
    %cst_82 = arith.constant 1.500000e+01 : f32
    %204 = vector.broadcast %cst_81 : f32 to vector<1x128xf32>
    %205 = arith.maximumf %204, %203 : vector<1x128xf32>
    %206 = vector.broadcast %cst_82 : f32 to vector<1x128xf32>
    %207 = arith.minimumf %206, %205 : vector<1x128xf32>
    %208 = math.floor %197 : vector<1x128xf32>
    %209 = math.floor %207 : vector<1x128xf32>
    %210 = arith.subf %197, %208 : vector<1x128xf32>
    %211 = arith.subf %207, %209 : vector<1x128xf32>
    %cst_83 = arith.constant 1.000000e+00 : f32
    %212 = vector.broadcast %cst_83 : f32 to vector<1x128xf32>
    %213 = arith.subf %212, %210 : vector<1x128xf32>
    %cst_84 = arith.constant 1.000000e+00 : f32
    %214 = vector.broadcast %cst_84 : f32 to vector<1x128xf32>
    %215 = arith.subf %214, %211 : vector<1x128xf32>
    %216 = arith.fptosi %208 : vector<1x128xf32> to vector<1x128xi32>
    %217 = arith.fptosi %209 : vector<1x128xf32> to vector<1x128xi32>
    %c1_i32_85 = arith.constant 1 : i32
    %218 = vector.broadcast %c1_i32_85 : i32 to vector<1x128xi32>
    %219 = arith.addi %216, %218 : vector<1x128xi32>
    %c15_i32_86 = arith.constant 15 : i32
    %220 = vector.broadcast %c15_i32_86 : i32 to vector<1x128xi32>
    %221 = arith.minsi %219, %220 : vector<1x128xi32>
    %c1_i32_87 = arith.constant 1 : i32
    %222 = vector.broadcast %c1_i32_87 : i32 to vector<1x128xi32>
    %223 = arith.addi %217, %222 : vector<1x128xi32>
    %c15_i32_88 = arith.constant 15 : i32
    %224 = vector.broadcast %c15_i32_88 : i32 to vector<1x128xi32>
    %225 = arith.minsi %223, %224 : vector<1x128xi32>
    %226 = vector.broadcast %216 : vector<1x128xi32> to vector<16x128xi32>
    %227 = arith.cmpi eq, %186, %226 : vector<16x128xi32>
    %cst_89 = arith.constant 0.000000e+00 : f32
    %228 = vector.shape_cast %213 : vector<1x128xf32> to vector<1x128xf32>
    %229 = vector.broadcast %228 : vector<1x128xf32> to vector<16x128xf32>
    %230 = vector.broadcast %cst_89 : f32 to vector<16x128xf32>
    %231 = arith.select %227, %229, %230 : vector<16x128xi1>, vector<16x128xf32>
    %232 = vector.broadcast %221 : vector<1x128xi32> to vector<16x128xi32>
    %233 = arith.cmpi eq, %186, %232 : vector<16x128xi32>
    %cst_90 = arith.constant 0.000000e+00 : f32
    %234 = vector.shape_cast %210 : vector<1x128xf32> to vector<1x128xf32>
    %235 = vector.broadcast %234 : vector<1x128xf32> to vector<16x128xf32>
    %236 = vector.broadcast %cst_90 : f32 to vector<16x128xf32>
    %237 = arith.select %233, %235, %236 : vector<16x128xi1>, vector<16x128xf32>
    %238 = arith.addf %231, %237 : vector<16x128xf32>
    %239 = vector.broadcast %217 : vector<1x128xi32> to vector<16x128xi32>
    %240 = arith.cmpi eq, %187, %239 : vector<16x128xi32>
    %cst_91 = arith.constant 0.000000e+00 : f32
    %241 = vector.shape_cast %215 : vector<1x128xf32> to vector<1x128xf32>
    %242 = vector.broadcast %241 : vector<1x128xf32> to vector<16x128xf32>
    %243 = vector.broadcast %cst_91 : f32 to vector<16x128xf32>
    %244 = arith.select %240, %242, %243 : vector<16x128xi1>, vector<16x128xf32>
    %245 = vector.broadcast %225 : vector<1x128xi32> to vector<16x128xi32>
    %246 = arith.cmpi eq, %187, %245 : vector<16x128xi32>
    %cst_92 = arith.constant 0.000000e+00 : f32
    %247 = vector.shape_cast %211 : vector<1x128xf32> to vector<1x128xf32>
    %248 = vector.broadcast %247 : vector<1x128xf32> to vector<16x128xf32>
    %249 = vector.broadcast %cst_92 : f32 to vector<16x128xf32>
    %250 = arith.select %246, %248, %249 : vector<16x128xi1>, vector<16x128xf32>
    %251 = arith.addf %244, %250 : vector<16x128xf32>
    %252 = vector.shape_cast %251 : vector<16x128xf32> to vector<16x1x128xf32>
    %253 = vector.shape_cast %238 : vector<16x128xf32> to vector<1x16x128xf32>
    %254 = vector.broadcast %252 : vector<16x1x128xf32> to vector<16x16x128xf32>
    %255 = vector.broadcast %253 : vector<1x16x128xf32> to vector<16x16x128xf32>
    %256 = arith.mulf %254, %255 : vector<16x16x128xf32>
    %257 = vector.shape_cast %256 : vector<16x16x128xf32> to vector<256x128xf32>
    %cst_93 = arith.constant dense<0.000000e+00> : vector<4x128xf32>
    %258 = tpu.matmul %0, %257, %cst_93 {dimension_numbers = #tpu.dot_dimension_numbers<[1], [0], [0], [1], [0, 0, 1, 1], [], []>} : vector<4x256xf32>, vector<256x128xf32>, vector<4x128xf32> -> vector<4x128xf32>
    %c0_94 = arith.constant 0 : index
    %c0_95 = arith.constant 0 : index
    %c0_96 = arith.constant 0 : index
    %259 = vector.load %arg3[%c0_94, %c0_95, %c0_96] : memref<1x4x128xf32, #tpu.memory_space<vmem>>, vector<1x4x128xf32>
    %260 = vector.shape_cast %259 : vector<1x4x128xf32> to vector<4x128xf32>
    %261 = vector.shape_cast %258 : vector<4x128xf32> to vector<1x4x128xf32>
    tpu.vector_store %arg3[%c0_94, %c0_95, %c0_96], %261 {strides = array<i32>} : memref<1x4x128xf32, #tpu.memory_space<vmem>>, vector<1x4x128xf32>,
    return
  }
  func.func @transform_0(%arg0: i32) -> (i32, i32) {
    %c0_i32 = arith.constant 0 : i32
    %c0_i32_0 = arith.constant 0 : i32
    return %c0_i32, %arg0 : i32, i32
  }
  func.func @transform_1(%arg0: i32) -> (i32, i32) {
    %c0_i32 = arith.constant 0 : i32
    %c0_i32_0 = arith.constant 0 : i32
    %c0_i32_1 = arith.constant 0 : i32
    return %c0_i32, %c0_i32_0 : i32, i32
  }
  func.func @transform_2(%arg0: i32) -> (i32, i32, i32) {
    %c0_i32 = arith.constant 0 : i32
    %c0_i32_0 = arith.constant 0 : i32
    %c0_i32_1 = arith.constant 0 : i32
    return %arg0, %c0_i32, %c0_i32_0 : i32, i32, i32
  }
}

</mosaic_0001>

<bundles_post_ra>
// kernel: _lambda_.1
= control target key start
LH: loop header
LB: loop body
LE: loop exit
PB: predicated region body
PF: predicated region fallthrough
CT: control target
= control target key end

     0   :  { %s1251_s9 = smov 0   ;;  %s1844_s0 = inlined_call_operand.vmem [shape: f32[4,512], index: 0, kind: input, shape index: {}]   ;;  %s1845_s1 = inlined_call_operand.vmem [shape: f32[96,128], index: 1, kind: input, shape index: {}]   ;;  %s1846_s2 = inlined_call_operand.vmem [shape: f32[2,4,128], index: 2, kind: output, shape index: {}]  }
   0x1 LB: > { %s1257_s10 = sadd.s32 4294967295, %s1222_s9   ;;  %p1087_p0 = scmp.ge.s32.totalorder %s1222_s9, 1  ;;  %s1222_s9 = sphi %s1251_s9, %s12_s9  }
   0x2   : > { %p113_p1 = scmp.lt.s32.totalorder %s1222_s9, 3 }
   0x4   : > { %p114_p2 = pnand %p1087_p0, %p113_p1 }
   0x5   : > { %s1088_s11 = sshll.u32 (!%p114_p2), %s1257_s10, 1  ;;  %s1224_s16 = smov (!%p114_p2), 127  }
   0x6   : > { %117 = sbr.rel (%p114_p2) target bundleno = 1631 (0x65f), region = 28  ;;  %p135_p3 = scmp.lt.s32.totalorder (!%p114_p2), %s1088_s11, 3 }
   0x7   : > { %s1225_s17 = smov (!%p114_p2), 1   ;;  %s1226_s18 = smov (!%p114_p2), 113  }
   0x8   : > { %s1227_s19 = smov (!%p114_p2), 112   ;;  %s1228_s20 = smov (!%p114_p2), 17  }
   0x9   : > { %s1229_s21 = smov (!%p114_p2), 111   ;;  %s1230_s22 = smov (!%p114_p2), 15  }
   0xa   : > { %s1231_s23 = smov (!%p114_p2), 16   ;;  %p140_p4 = scmp.lt.s32.totalorder (!%p114_p2), %s1257_s10, 1 }
   0xb   : > { %s1922_s11 = smov (!%p135_p3, %s1088_s11), 3  ;;  %v145_v26 = vlaneseq  ;;  %v1286_v32 = vld [vmem:[%s1845_s1 + $0x48] sm:$0xff]  ;;  %v1232_v33 = vmov 36   ;;  %vm347_vm14 = vcmask 1043456   ;;  %v1233_v51 = vmov 72  }
   0xc   : > { %s1089_s12 = sshll.u32 %s1922_s11, 2  ;;  %1213 = vset.pattern.permute.xlu0 %v1232_v33  ;;  %1215 = vset.pattern.permute.xlu1 %v1233_v51  ;;  %s1924_s10 = smov (!%p140_p4, %s1257_s10), 1 }
   0xd   : > { %s138_s15 = scalar_lea.vmem %s1844_s0, %s1089_s12  ;;  %v1279_v27 = vand.u32 127, %v145_v26 }
   0xe   : > { %v144_v0 = vld [vmem:[%s138_s15] sm:$0xff] }
   0xf   : > { %158 = vst [vmem:[#allocation1] ss:$2 sm:$0xff] %v144_v0  ;;  %v147_v29 = vadd.s32 128, %v1279_v27  ;;  %v148_v30 = vand.u32 255, %v1279_v27  ;;  %vm1852_vm0 = vcmp.lt.s32.totalorder %v1279_v27, 112  ;;  %vm1847_vm1 = vcmp.lt.s32.totalorder %v1279_v27, 127 }
  0x10   : > { %vm1848_vm5 = vcmp.lt.s32.totalorder %v1279_v27, 113  ;;  %vm1849_vm11 = vcmp.lt.s32.totalorder %v1279_v27, 1  ;;  %vm1854_vm12 = vcmp.lt.s32.totalorder %v1279_v27, 111 }
  0x11   : > { %v149_v31 = vand.u32 255, %v147_v29  ;;  %v1289_v36 = vshra.s32 %v148_v30, 4  ;;  %v1291_v37 = vand.u32 15, %v148_v30 }
  0x13   : > { %v1293_v38 = vshra.s32 %v149_v31, 4  ;;  %v1295_v39 = vand.u32 15, %v149_v31  ;;  %vm1851_vm2 = vcmp.lt.s32.totalorder %v1289_v36, 15  ;;  %vm1855_vm3 = vcmp.ge.s32.totalorder %v1291_v37, 1 }
  0x14   : > { %vm1853_vm7 = vcmp.lt.s32.totalorder %v1291_v37, 15  ;;  %vm1314_vm9 = vmand %vm1851_vm2, %vm1855_vm3 }
  0x15   : > { %vm1850_vm4 = vcmp.lt.s32.totalorder %v1293_v38, 15  ;;  %vm173_vm6 = vcmp.ge.s32.totalorder %v1295_v39, 1  ;;  %vm213_vm8 = vcmp.lt.s32.totalorder %v1295_v39, 15  ;;  %vm1342_vm13 = vmand %vm1851_vm2, %vm1853_vm7 }
  0x16   : > { %v159_v1 = vld.sshfl [vmem:[#allocation1] sm:$0xff pattern:$0x75316420]  ;;  %v160_v2 = vld.sshfl [vmem:[#allocation1 + $0x8] sm:$0xff pattern:$0x75316420]  ;;  %vm1330_vm10 = vmand %vm1850_vm4, %vm173_vm6 }
  0x17   : > { %182 = vst [vmem:[#allocation1] ss:$2 sm:$0xff] %v144_v0  ;;  %v1208_v19 = vpack.i.bf16 %v160_v2, %v159_v1  ;;  %vm1352_vm15 = vmand %vm1850_vm4, %vm213_vm8 }
  0x1e   : > { %v183_v3 = vld.sshfl [vmem:[#allocation1] sm:$0xff pattern:$0x75316420]  ;;  %v184_v4 = vld.sshfl [vmem:[#allocation1 + $0x8] sm:$0xff pattern:$0x75316420] }
  0x1f   : > { %200 = vst [vmem:[#allocation1] ss:$2 sm:$0xff] %v144_v0  ;;  %v1198_v23 = vpack.i.bf16 %v184_v4, %v183_v3 }
  0x26   : > { %v201_v5 = vld.sshfl [vmem:[#allocation1] sm:$0xff pattern:$0x75316420]  ;;  %v202_v6 = vld.sshfl [vmem:[#allocation1 + $0x8] sm:$0xff pattern:$0x75316420] }
  0x27   : > { %222 = vst [vmem:[#allocation1] ss:$2 sm:$0xff] %v144_v0  ;;  %v1203_v22 = vpack.i.bf16 %v202_v6, %v201_v5 }
  0x2e   : > { %v223_v7 = vld.sshfl [vmem:[#allocation1] sm:$0xff pattern:$0x75316420]  ;;  %v224_v8 = vld.sshfl [vmem:[#allocation1 + $0x8] sm:$0xff pattern:$0x75316420] }
  0x2f   : > { %240 = vst [vmem:[#allocation1] ss:$2 sm:$0xff] %v144_v0  ;;  %v1178_v12 = vpack.i.bf16 %v224_v8, %v223_v7 }
  0x31   : > { %1179 = vrot.lane.b32.xlu2 %v1178_v12, %s1225_s17 }
  0x36   : > { %v241_v9 = vld.sshfl [vmem:[#allocation1] sm:$0xff pattern:$0x75316420]  ;;  %v242_v10 = vld.sshfl [vmem:[#allocation1 + $0x8] sm:$0xff pattern:$0x75316420] }
  0x37   : > { %v1183_v11 = vpack.i.bf16 %v242_v10, %v241_v9  ;;  %258 = vst [vmem:[#allocation1] ss:$2 sm:$0xff] %v144_v0 }
  0x39   : > { %1184 = vrot.lane.b32.xlu1 %v1183_v11, %s1224_s16 }
  0x3e   : > { %v259_v13 = vld.sshfl [vmem:[#allocation1] sm:$0xff pattern:$0x75316420]  ;;  %v260_v14 = vld.sshfl [vmem:[#allocation1 + $0x8] sm:$0xff pattern:$0x75316420] }
  0x3f   : > { %280 = vst [vmem:[#allocation1] ss:$2 sm:$0xff] %v144_v0  ;;  %v1188_v15 = vpack.i.bf16 %v260_v14, %v259_v13 }
  0x41   : > { %1189 = vrot.lane.b32.xlu2 %v1188_v15, %s1226_s18 }
  0x46   : > { %v281_v16 = vld.sshfl [vmem:[#allocation1] sm:$0xff pattern:$0x75316420]  ;;  %v282_v17 = vld.sshfl [vmem:[#allocation1 + $0x8] sm:$0xff pattern:$0x75316420] }
  0x47   : > { %v1193_v18 = vpack.i.bf16 %v282_v17, %v281_v16  ;;  %298 = vst [vmem:[#allocation1] ss:$2 sm:$0xff] %v144_v0 }
  0x49   : > { %1194 = vrot.lane.b32.xlu0 %v1193_v18, %s1227_s19  ;;  %1209 = vrot.lane.b32.xlu2 %v1208_v19, %s1228_s20 }
  0x4e   : > { %v300_v20 = vld.sshfl [vmem:[#allocation1 + $0x8] sm:$0xff pattern:$0x75316420]  ;;  %v299_v21 = vld.sshfl [vmem:[#allocation1] sm:$0xff pattern:$0x75316420] }
  0x4f   : > { %305 = vrot.lane.b32.xlu1 %v300_v20, %s1229_s21  ;;  %330 = vst [vmem:[#allocation1] ss:$2 sm:$0xff] %v144_v0 }
  0x51   : > { %303 = vrot.lane.b32.xlu0 %v299_v21, %s1229_s21 }
  0x56   : > { %v1274_v24 = vld.sshfl [vmem:[#allocation1] sm:$0xff pattern:$0x75316420]  ;;  %v1276_v25 = vld.sshfl [vmem:[#allocation1 + $0x8] sm:$0xff pattern:$0x75316420] }
  0x57   : > { %1204 = vrot.lane.b32.xlu1 %v1203_v22, %s1230_s22  ;;  %984 = vst [vmem:[#allocation1] ss:$2 sm:$0xff] %v144_v0 }
  0x59   : > { %1199 = vrot.lane.b32.xlu0 %v1198_v23, %s1231_s23 }
  0x61   : > { %358 = vperm.xlu0 %1213, %v1286_v32  }
  0x69   : > { %1214 = vset.pattern.permute.xlu0 %v1233_v51 }
  0x8b   : > { %v1180_v28 = vpop.permute.xlu2 %1179 }
  0x8c   : > { %v1182_v47 = vunpack.i.h.bf16 %v1180_v28  ;;  %v1181_v48 = vunpack.i.l.bf16 %v1180_v28 }
  0x8e   : > { %v233_v4 = vsel %vm1849_vm11, %v1182_v47, %v1181_v48  ;;  %v232_v9 = vsel %vm1849_vm11, %v1181_v48, %v1182_v47  ;;  %vm1856_vm11 = vcmp.lt.s32.totalorder %v1279_v27, 17 }
  0x8f   : > { %v238_v14 = vsel %vm1855_vm3, %v233_v4, 0.0  ;;  %v239_v19 = vsel %vm173_vm6, %v232_v9, 0.0 }
  0x90   : > { %v326_v30 = vrot.slane %v238_v14, 4  ;;  %v327_v31 = vrot.slane %v239_v19, 4 }
  0x9b   : > { %v1190_v35 = vpop.permute.xlu2 %1189 }
  0x9c   : > { %v1192_v43 = vunpack.i.h.bf16 %v1190_v35  ;;  %v1191_v44 = vunpack.i.l.bf16 %v1190_v35 }
  0x9e   : > { %v268_v54 = vsel %vm1848_vm5, %v1191_v44, %v1192_v43  ;;  %v269_v60 = vsel %vm1848_vm5, %v1192_v43, %v1191_v44  ;;  %vm1857_vm5 = vcmp.ge.s32.totalorder %v1293_v38, 1 }
  0x9f   : > { %v278_v1 = vsel %vm1314_vm9, %v268_v54, 0.0  ;;  %v279_v7 = vsel %vm1330_vm10, %v269_v60, 0.0 }
  0xa3   : > { %v1210_v8 = vpop.permute.xlu2 %1209 }
  0xa4   : > { %v1212_v17 = vunpack.i.h.bf16 %v1210_v8  ;;  %v1211_v18 = vunpack.i.l.bf16 %v1210_v8 }
  0xa6   : > { %v169_v33 = vsel %vm1856_vm11, %v1212_v17, %v1211_v18  ;;  %v168_v35 = vsel %vm1856_vm11, %v1211_v18, %v1212_v17  ;;  %vm361_vm11 = vcmask 293888  }
  0xab   : > { %v1185_v34 = vpop.permute.xlu1 %1184 }
  0xac   : > { %v1187_v40 = vunpack.i.h.bf16 %v1185_v34  ;;  %v1186_v41 = vunpack.i.l.bf16 %v1185_v34 }
  0xae   : > { %v250_v52 = vsel %vm1847_vm1, %v1186_v41, %v1187_v40  ;;  %v251_v53 = vsel %vm1847_vm1, %v1187_v40, %v1186_v41  ;;  %vm1858_vm1 = vcmp.ge.s32.totalorder %v1289_v36, 1 }
  0xaf   : > { %v256_v62 = vsel %vm1853_vm7, %v250_v52, 0.0  ;;  %v257_v63 = vsel %vm213_vm8, %v251_v53, 0.0 }
  0xb0   : > { %v337_v12 = vrot.slane %v256_v62, 4  ;;  %v338_v13 = vrot.slane %v257_v63, 4 }
  0xb2   : > { %v352_v21 = vsel %vm347_vm14, %v1274_v24, %v337_v12  ;;  %v353_v22 = vsel %vm347_vm14, %v1276_v25, %v338_v13  ;;  %v751_v24 = vld [vmem:[%s1845_s1] sm:$0xff] }
  0xbb   : > { %v1195_v42 = vpop.permute.xlu0 %1194 }
  0xbc   : > { %v1197_v45 = vunpack.i.h.bf16 %v1195_v42  ;;  %v1196_v46 = vunpack.i.l.bf16 %v1195_v42 }
  0xbe   : > { %v290_v49 = vsel %vm1852_vm0, %v1196_v46, %v1197_v45  ;;  %v291_v50 = vsel %vm1852_vm0, %v1197_v45, %v1196_v46  ;;  %vm1404_vm0 = vmand %vm1857_vm5, %vm213_vm8 }
  0xbf   : > { %v296_v55 = vsel %vm1851_vm2, %v290_v49, 0.0  ;;  %v297_v57 = vsel %vm1850_vm4, %v291_v50, 0.0  ;;  %vm209_vm4 = vcmp.lt.s32.totalorder %v1279_v27, 15  ;;  %vm1396_vm2 = vmand %vm1858_vm1, %vm1853_vm7 }
  0xc0   : > { %v343_v2 = vrot.slane %v296_v55, 4  ;;  %v344_v3 = vrot.slane %v297_v57, 4  ;;  %vm1414_vm7 = vmand %vm1858_vm1, %vm1855_vm3 }
  0xc1   : > { %v306_v58 = vpop.permute.xlu1 %305  ;;  %vm1429_vm3 = vmand %vm1857_vm5, %vm173_vm6  ;;  %v180_v52 = vsel %vm1414_vm7, %v169_v33, 0.0 }
  0xc2   : > { %v354_v15 = vsel %vm347_vm14, %v278_v1, %v343_v2  ;;  %v355_v16 = vsel %vm347_vm14, %v279_v7, %v344_v3  ;;  %v181_v54 = vsel %vm1429_vm3, %v168_v35, 0.0 }
  0xc3   : > { %v304_v0 = vpop.permute.xlu0 %303 }
  0xc4   : > { %v308_v5 = vsel %vm1854_vm12, %v304_v0, %v306_v58  ;;  %v309_v6 = vsel %vm1854_vm12, %v306_v58, %v304_v0  ;;  %vm191_vm12 = vcmp.lt.s32.totalorder %v1279_v27, 16 }
  0xc5   : > { %v316_v10 = vsel %vm1342_vm13, %v308_v5, 0.0  ;;  %v317_v11 = vsel %vm1352_vm15, %v309_v6, 0.0 }
  0xc6   : > { %1091 = vmatpush.msk.msra.mxu2 %vm347_vm14, %v316_v10  ;;  %1093 = vmatpush.msk.msra.mxu3 %vm347_vm14, %v317_v11 }
  0xc8   : > { %382 = vmatpush.msra.mxu2 %v354_v15  ;;  %402 = vmatpush.msra.mxu3 %v355_v16 }
  0xc9   : > { %v1205_v20 = vpop.permute.xlu1 %1204 }
  0xca   : > { %v1207_v28 = vunpack.i.h.bf16 %v1205_v20  ;;  %v1206_v29 = vunpack.i.l.bf16 %v1205_v20  ;;  %383 = vmatpush.msra.mxu2 %v352_v21  ;;  %403 = vmatpush.msra.mxu3 %v353_v22  ;;  %v1502_v20 = vshrl.u32 %v145_v26, 7  ;;  %v1515_v26 = vld [vmem:[%s1845_s1 + $0x50] sm:$0xff] }
  0xcb   : > { %v1200_v25 = vpop.permute.xlu0 %1199 }
  0xcc   : > { %v1202_v40 = vunpack.i.h.bf16 %v1200_v25  ;;  %v1201_v41 = vunpack.i.l.bf16 %v1200_v25  ;;  %v211_v42 = vsel %vm209_vm4, %v1207_v28, %v1206_v29  ;;  %v210_v43 = vsel %vm209_vm4, %v1206_v29, %v1207_v28 }
  0xcd   : > { %v220_v45 = vsel %vm1396_vm2, %v211_v42, 0.0  ;;  %v221_v46 = vsel %vm1404_vm0, %v210_v43, 0.0  ;;  %v557_v56 = vadd.s32 120, %v1502_v20  ;;  %v573_v22 = vadd.s32 248, %v1502_v20 }
  0xce   : > { %v350_v47 = vsel %vm347_vm14, %v220_v45, %v326_v30  ;;  %v351_v48 = vsel %vm347_vm14, %v221_v46, %v327_v31  ;;  %v193_v49 = vsel %vm191_vm12, %v1202_v40, %v1201_v41  ;;  %v192_v50 = vsel %vm191_vm12, %v1201_v41, %v1202_v40  ;;  %v1520_v30 = vld [vmem:[%s1845_s1 + $0x58] sm:$0xff] }
  0xcf   : > { %384 = vmatpush.msra.mxu2 %v350_v47  ;;  %404 = vmatpush.msra.mxu3 %v351_v48  ;;  %v198_v53 = vsel %vm1858_vm1, %v193_v49, 0.0  ;;  %v199_v55 = vsel %vm1857_vm5, %v192_v50, 0.0  ;;  %vm1877_vm5 = vcmp.lt.s32.totalorder %v1279_v27, 112  ;;  %v556_v28 = vadd.s32 112, %v1502_v20 }
  0xd0   : > { %v320_v57 = vrot.slane %v198_v53, 4  ;;  %v321_v58 = vrot.slane %v199_v55, 4  ;;  %vm1878_vm1 = vmmov %vm1877_vm5  ;;  %v572_v29 = vadd.s32 240, %v1502_v20  ;;  %v555_v25 = vadd.s32 104, %v1502_v20 }
  0xd1   : > { %v571_v31 = vadd.s32 232, %v1502_v20  ;;  %v554_v33 = vadd.s32 96, %v1502_v20  ;;  %v570_v35 = vadd.s32 224, %v1502_v20  ;;  %v589_v40 = vshra.s32 %v557_v56, 8 }
  0xd2   : > { %v348_v60 = vsel %vm347_vm14, %v180_v52, %v320_v57  ;;  %v349_v62 = vsel %vm347_vm14, %v181_v54, %v321_v58  ;;  %v605_v41 = vshra.s32 %v573_v22, 8  ;;  %v588_v42 = vshra.s32 %v556_v28, 8 }
  0xd3   : > { %385 = vmatpush.msra.mxu2 %v348_v60  ;;  %405 = vmatpush.msra.mxu3 %v349_v62  ;;  %v359_v63 = vpop.permute.xlu0 %358  ;;  %v604_v43 = vshra.s32 %v572_v29, 8  ;;  %v587_v46 = vshra.s32 %v555_v25, 8  ;;  %v603_v47 = vshra.s32 %v571_v31, 8  ;;  %v586_v50 = vshra.s32 %v554_v33, 8 }
  0xd4   : > { %1092 = vmatmul.msk.f32.vlgmr.msra.gmra.mxu2 %vm361_vm11, %v1286_v32  ;;  %1094 = vmatmul.msk.f32.vlgmr.msra.gmra.mxu3 %vm361_vm11, %v1286_v32  ;;  %vm1875_vm11 = vcmp.lt.s32.totalorder %v1279_v27, 111  ;;  %v1234_v52 = vmov 0.00390625   ;;  %v553_v54 = vadd.s32 88, %v1502_v20  ;;  %v569_v39 = vadd.s32 216, %v1502_v20 }
  0xd5   : > { %vm1876_vm14 = vmmov %vm1875_vm11  ;;  %v552_v57 = vadd.s32 80, %v1502_v20  ;;  %v568_v58 = vadd.s32 208, %v1502_v20  ;;  %v551_v60 = vadd.s32 72, %v1502_v20  ;;  %v564_v56 = vadd.s32 176, %v1502_v20 }
  0xd6   : > { %v547_v29 = vadd.s32 40, %v1502_v20  ;;  %v563_v25 = vadd.s32 168, %v1502_v20  ;;  %v546_v33 = vadd.s32 32, %v1502_v20  ;;  %v561_v53 = vadd.s32 152, %v1502_v20 }
  0xd7   : > { %v560_v34 = vadd.s32 144, %v1502_v20 }
 0x157   : > { %v387_v0 = vpop.f32.mrf.mxu2  ;;  %v407_v1 = vpop.f32.mrf.mxu3 }
 0x158   : > { %v388_v2 = vadd.f32 %v387_v0, %v359_v63  ;;  %v408_v3 = vadd.f32 %v407_v1, %v359_v63  ;;  %v585_v0 = vshra.s32 %v553_v54, 8  ;;  %v601_v1 = vshra.s32 %v569_v39, 8 }
 0x159   : > { %v544_v39 = vadd.s32 16, %v1502_v20  ;;  %v558_v63 = vadd.s32 128, %v1502_v20 }
 0x15a   : > { %v410_v4 = vmax.f32 %v388_v2, 0.0  ;;  %v411_v5 = vmax.f32 %v408_v3, 0.0  ;;  %v567_v2 = vadd.s32 200, %v1502_v20 }
 0x15b   : > { %v576_v55 = vshra.s32 %v544_v39, 8 }
 0x15c   : > { %470 = vrot.lane.b32.xlu2 %v411_v5, %s1229_s21  ;;  %452 = vrot.lane.b32.xlu0 %v410_v4, %s1226_s18 }
 0x15d   : > { %468 = vrot.lane.b32.xlu1 %v410_v4, %s1229_s21 }
 0x164   : > { %462 = vrot.lane.b32.xlu2 %v411_v5, %s1227_s19  ;;  %446 = vrot.lane.b32.xlu0 %v411_v5, %s1224_s16 }
 0x165   : > { %460 = vrot.lane.b32.xlu1 %v410_v4, %s1227_s19 }
 0x16c   : > { %444 = vrot.lane.b32.xlu2 %v410_v4, %s1224_s16  ;;  %428 = vrot.lane.b32.xlu0 %v410_v4, %s1230_s22 }
 0x16d   : > { %454 = vrot.lane.b32.xlu1 %v411_v5, %s1226_s18 }
 0x174   : > { %438 = vrot.lane.b32.xlu2 %v411_v5, %s1225_s17  ;;  %422 = vrot.lane.b32.xlu0 %v411_v5, %s1231_s23 }
 0x175   : > { %436 = vrot.lane.b32.xlu1 %v410_v4, %s1225_s17 }
 0x17c   : > { %420 = vrot.lane.b32.xlu2 %v410_v4, %s1231_s23  ;;  %478 = vperm.xlu0 %1214, %v1515_v26   ;;  %s1090_s23 = sshll.u32 %s1924_s10, 2 }
 0x17d   : > { %430 = vrot.lane.b32.xlu1 %v411_v5, %s1230_s22  ;;  %s1235_s22 = smov 120   ;;  %s143_s26 = scalar_lea.vmem %s1846_s2, %s1090_s23 }
 0x184   : > { %414 = vrot.lane.b32.xlu2 %v411_v5, %s1228_s20 }
 0x185   : > { %412 = vrot.lane.b32.xlu1 %v410_v4, %s1228_s20 }
 0x18d   : > { %483 = vperm.xlu1 %1215, %v1520_v30  }
 0x1b6   : > { %v471_v32 = vpop.permute.xlu2 %470 }
 0x1be   : > { %v463_v7 = vpop.permute.xlu2 %462 }
 0x1c6   : > { %v445_v15 = vpop.permute.xlu2 %444 }
 0x1ce   : > { %v453_v6 = vpop.permute.xlu0 %452  ;;  %v439_v21 = vpop.permute.xlu2 %438 }
 0x1cf   : > { %v469_v8 = vpop.permute.xlu1 %468 }
 0x1d0   : > { %v472_v9 = vsel %vm1875_vm11, %v469_v8, %v471_v32  ;;  %v473_v10 = vsel %vm1876_vm14, %v471_v32, %v469_v8  ;;  %vm1879_vm11 = vcmp.lt.s32.totalorder %v1289_v36, 15  ;;  %vm1880_vm14 = vcmp.lt.s32.totalorder %v1293_v38, 15 }
 0x1d1   : > { %1095 = vmatpush.msk.msrb.mxu2 %vm1342_vm13, %v472_v9  ;;  %1105 = vmatpush.msk.msrb.mxu3 %vm1352_vm15, %v473_v10  ;;  %vm1881_vm13 = vcmp.lt.s32.totalorder %v1279_v27, 113  ;;  %v600_v32 = vshra.s32 %v568_v58, 8  ;;  %v599_v8 = vshra.s32 %v567_v2, 8  ;;  %v566_v9 = vadd.s32 192, %v1502_v20 }
 0x1d2   : > { %vm1882_vm15 = vmmov %vm1881_vm13  ;;  %v1731_v58 = vadd.s32 8, %v1502_v20 }
 0x1d6   : > { %v447_v12 = vpop.permute.xlu0 %446  ;;  %v421_v3 = vpop.permute.xlu2 %420 }
 0x1d7   : > { %v461_v11 = vpop.permute.xlu1 %460 }
 0x1d8   : > { %v464_v13 = vsel %vm1877_vm5, %v461_v11, %v463_v7  ;;  %v465_v14 = vsel %vm1878_vm1, %v463_v7, %v461_v11  ;;  %vm1883_vm1 = vcmp.lt.s32.totalorder %v1279_v27, 127  ;;  %v583_v7 = vshra.s32 %v551_v60, 8 }
 0x1d9   : > { %1096 = vmatpush.msk.msrb.mxu2 %vm1879_vm11, %v464_v13  ;;  %1106 = vmatpush.msk.msrb.mxu3 %vm1880_vm14, %v465_v14  ;;  %v448_v18 = vsel %vm1883_vm1, %v445_v15, %v447_v12  ;;  %vm1884_vm5 = vmmov %vm1883_vm1  ;;  %vm1885_vm11 = vcmp.lt.s32.totalorder %v1291_v37, 15  ;;  %vm637_vm14 = vcmp.eq.s32.totalorder %v605_v41, %v1279_v27  ;;  %vm636_vm1 = vcmp.eq.s32.totalorder %v604_v43, %v1279_v27  ;;  %v748_v14 = vld [vmem:[%s1845_s1 + $0x30] sm:$0xff] }
 0x1da   : > { %v449_v19 = vsel %vm1884_vm5, %v447_v12, %v445_v15  ;;  %1131 = vmatpush.msk.msra.mxu1 %vm637_vm14, %v1234_v52  ;;  %vm1543_vm5 = vcmp.eq.s32.totalorder %v587_v46, %v1279_v27  ;;  %v579_v46 = vshra.s32 %v547_v29, 8  ;;  %v559_v60 = vadd.s32 136, %v1502_v20 }
 0x1dc   : > { %1132 = vmatpush.msk.msra.mxu1 %vm636_vm1, %v1234_v52 }
 0x1de   : > { %v1495_v17 = vpop.permute.xlu0 %428  ;;  %v415_v41 = vpop.permute.xlu2 %414 }
 0x1df   : > { %v455_v59 = vpop.permute.xlu1 %454 }
 0x1e0   : > { %v456_v61 = vsel %vm1881_vm13, %v453_v6, %v455_v59  ;;  %v457_v16 = vsel %vm1882_vm15, %v455_v59, %v453_v6  ;;  %vm1888_vm13 = vcmp.ge.s32.totalorder %v1291_v37, 1  ;;  %vm620_vm15 = vcmp.eq.s32.totalorder %v588_v42, %v1279_v27 }
 0x1e1   : > { %1097 = vmatpush.msk.msrb.mxu2 %vm1314_vm9, %v456_v61  ;;  %1107 = vmatpush.msk.msrb.mxu3 %vm1330_vm10, %v457_v16  ;;  %vm621_vm10 = vcmp.eq.s32.totalorder %v589_v40, %v1279_v27  ;;  %v602_v37 = vshra.s32 %v570_v35, 8  ;;  %v550_v6 = vadd.s32 64, %v1502_v20  ;;  %v596_v35 = vshra.s32 %v564_v56, 8  ;;  %v750_v56 = vld [vmem:[%s1845_s1 + $0x40] sm:$0x1] }
 0x1e2   : > { %1115 = vmatpush.msk.msra.mxu0 %vm621_vm10, %v1234_v52  ;;  %vm1586_vm10 = vcmp.eq.s32.totalorder %v601_v1, %v1279_v27  ;;  %v562_v40 = vadd.s32 160, %v1502_v20  ;;  %v590_v1 = vshra.s32 %v558_v63, 8 }
 0x1e3   : > { %1098 = vmatpush.msk.msrb.mxu2 %vm1885_vm11, %v448_v18  ;;  %1108 = vmatpush.msk.msrb.mxu3 %vm213_vm8, %v449_v19  ;;  %vm1886_vm8 = vcmp.lt.s32.totalorder %v1279_v27, 1  ;;  %vm1560_vm11 = vcmp.eq.s32.totalorder %v586_v50, %v1279_v27  ;;  %v582_v16 = vshra.s32 %v550_v6, 8  ;;  %v549_v18 = vadd.s32 56, %v1502_v20 }
 0x1e4   : > { %vm1887_vm9 = vmmov %vm1886_vm8  ;;  %1116 = vmatpush.msk.msra.mxu0 %vm620_vm15, %v1234_v52  ;;  %v565_v19 = vadd.s32 184, %v1502_v20  ;;  %v545_v50 = vadd.s32 24, %v1502_v20  ;;  %v594_v54 = vshra.s32 %v562_v40, 8 }
 0x1e5   : > { %502 = vmatpush.msrb.mxu2 %v410_v4  ;;  %525 = vmatpush.msrb.mxu3 %v411_v5  ;;  %v584_v5 = vshra.s32 %v552_v57, 8  ;;  %v581_v22 = vshra.s32 %v549_v18, 8  ;;  %vm1651_vm15 = vcmp.eq.s32.totalorder %v582_v16, %v1279_v27  ;;  %v592_v57 = vshra.s32 %v560_v34, 8 }
 0x1e6   : > { %v423_v62 = vpop.permute.xlu0 %422  ;;  %1117 = vmatpush.msk.msra.mxu0 %vm1543_vm5, %v1234_v52  ;;  %v597_v28 = vshra.s32 %v565_v19, 8  ;;  %vm486_vm5 = vcmask 588800   ;;  %v577_v44 = vshra.s32 %v545_v50, 8  ;;  %v754_v19 = vld [vmem:[%s1845_s1 + $0x18] sm:$0xff] }
 0x1e7   : > { %v437_v45 = vpop.permute.xlu1 %436  ;;  %v425_v11 = vsel %vm191_vm12, %v423_v62, %v421_v3  ;;  %vm1591_vm14 = vcmp.eq.s32.totalorder %v584_v5, %v1279_v27  ;;  %v424_v51 = vsel %vm191_vm12, %v421_v3, %v423_v62  ;;  %vm1910_vm12 = vcmp.ge.s32.totalorder %v1293_v38, 1 }
 0x1e8   : > { %v441_v48 = vsel %vm1886_vm8, %v439_v21, %v437_v45  ;;  %v440_v49 = vsel %vm1887_vm9, %v437_v45, %v439_v21  ;;  %vm1566_vm8 = vcmp.eq.s32.totalorder %v602_v37, %v1279_v27  ;;  %vm1581_vm9 = vcmp.eq.s32.totalorder %v585_v0, %v1279_v27  ;;  %1118 = vmatpush.msk.msra.mxu0 %vm1560_vm11, %v1234_v52 }
 0x1e9   : > { %1099 = vmatpush.msk.msrb.mxu2 %vm1888_vm13, %v441_v48  ;;  %1109 = vmatpush.msk.msrb.mxu3 %vm173_vm6, %v440_v49  ;;  %vm1550_vm6 = vcmp.eq.s32.totalorder %v603_v47, %v1279_v27  ;;  %vm1608_vm13 = vcmp.eq.s32.totalorder %v600_v32, %v1279_v27  ;;  %v548_v21 = vadd.s32 48, %v1502_v20  ;;  %vm1674_vm11 = vcmp.eq.s32.totalorder %v597_v28, %v1279_v27 }
 0x1ea   : > { %1133 = vmatpush.msk.msra.mxu1 %vm1550_vm6, %v1234_v52  ;;  %1119 = vmatpush.msk.msra.mxu0 %vm1581_vm9, %v1234_v52  ;;  %vm1669_vm6 = vcmp.eq.s32.totalorder %v581_v22, %v1279_v27  ;;  %v595_v47 = vshra.s32 %v563_v25, 8  ;;  %v578_v37 = vshra.s32 %v546_v33, 8  ;;  %v575_v62 = vshra.s32 %v1731_v58, 8  ;;  %v805_v25 = vld [vmem:[%s1845_s1 + $0x28] sm:$0xff] }
 0x1eb   : > { %v580_v31 = vshra.s32 %v548_v21, 8  ;;  %v574_v0 = vshra.s32 %v1502_v20, 8  ;;  %v753_v21 = vld [vmem:[%s1845_s1 + $0x10] sm:$0xff] }
 0x1ec   : > { %1134 = vmatpush.msk.msra.mxu1 %vm1566_vm8, %v1234_v52  ;;  %1120 = vmatpush.msk.msra.mxu0 %vm1591_vm14, %v1234_v52  ;;  %vm1919_vm8 = vcmp.lt.s32.totalorder %v1279_v27, 17  ;;  %vm628_vm14 = vcmp.eq.s32.totalorder %v596_v35, %v1279_v27 }
 0x1ed   : > { %vm1920_vm9 = vmmov %vm1919_vm8 }
 0x1ee   : > { %1135 = vmatpush.msk.msra.mxu1 %vm1586_vm10, %v1234_v52  ;;  %vm612_vm10 = vcmp.eq.s32.totalorder %v580_v31, %v1279_v27  ;;  %v479_v2 = vpop.permute.xlu0 %478 }
 0x1ef   : > { %v431_v10 = vpop.permute.xlu1 %430 }
 0x1f0   : > { %v433_v15 = vsel %vm209_vm4, %v431_v10, %v1495_v17  ;;  %v432_v59 = vsel %vm209_vm4, %v1495_v17, %v431_v10  ;;  %v598_v17 = vshra.s32 %v566_v9, 8  ;;  %vm1909_vm4 = vcmp.ge.s32.totalorder %v1289_v36, 1  ;;  %1136 = vmatpush.msk.msra.mxu1 %vm1608_vm13, %v1234_v52  ;;  %v755_v36 = vld [vmem:[%s1845_s1 + $0x20] sm:$0x1] }
 0x1f1   : > { %1100 = vmatpush.msk.msrb.mxu2 %vm1396_vm2, %v433_v15  ;;  %1110 = vmatpush.msk.msrb.mxu3 %vm1404_vm0, %v432_v59  ;;  %vm1628_vm0 = vcmp.eq.s32.totalorder %v583_v7, %v1279_v27  ;;  %vm1633_vm2 = vcmp.eq.s32.totalorder %v599_v8, %v1279_v27  ;;  %vm610_vm13 = vcmp.eq.s32.totalorder %v578_v37, %v1279_v27 }
 0x1f2   : > { %vm1656_vm1 = vcmp.eq.s32.totalorder %v598_v17, %v1279_v27  ;;  %1121 = vmatpush.msk.msra.mxu0 %vm1628_vm0, %v1234_v52  ;;  %1137 = vmatpush.msk.msra.mxu1 %vm1633_vm2, %v1234_v52  ;;  %vm626_vm0 = vcmp.eq.s32.totalorder %v594_v54, %v1279_v27  ;;  %vm609_vm2 = vcmp.eq.s32.totalorder %v577_v44, %v1279_v27 }
 0x1f3   : > { %1101 = vmatpush.msk.msrb.mxu2 %vm1909_vm4, %v425_v11  ;;  %1111 = vmatpush.msk.msrb.mxu3 %vm1910_vm12, %v424_v51  ;;  %vm608_vm12 = vcmp.eq.s32.totalorder %v576_v55, %v1279_v27  ;;  %v752_v51 = vld [vmem:[%s1845_s1 + $0x8] sm:$0xff] }
 0x1f4   : > { %1122 = vmatpush.msk.msra.mxu0 %vm1651_vm15, %v1234_v52  ;;  %1138 = vmatpush.msk.msra.mxu1 %vm1656_vm1, %v1234_v52  ;;  %vm624_vm15 = vcmp.eq.s32.totalorder %v592_v57, %v1279_v27  ;;  %vm607_vm1 = vcmp.eq.s32.totalorder %v575_v62, %v1279_v27 }
 0x1f6   : > { %1123 = vmatpush.msk.msra.mxu0 %vm1669_vm6, %v1234_v52  ;;  %1139 = vmatpush.msk.msra.mxu1 %vm1674_vm11, %v1234_v52  ;;  %vm606_vm6 = vcmp.eq.s32.totalorder %v574_v0, %v1279_v27  ;;  %vm622_vm11 = vcmp.eq.s32.totalorder %v590_v1, %v1279_v27 }
 0x1f7   : > { %v413_v42 = vpop.permute.xlu1 %412 }
 0x1f8   : > { %v417_v48 = vsel %vm1919_vm8, %v415_v41, %v413_v42  ;;  %v416_v49 = vsel %vm1920_vm9, %v413_v42, %v415_v41  ;;  %1124 = vmatpush.msk.msra.mxu0 %vm612_vm10, %v1234_v52  ;;  %1140 = vmatpush.msk.msra.mxu1 %vm628_vm14, %v1234_v52  ;;  %vm756_vm8 = vcmask 130048   ;;  %vm781_vm9 = vcmask 261120  }
 0x1f9   : > { %1102 = vmatpush.msk.msrb.mxu2 %vm1414_vm7, %v417_v48  ;;  %1112 = vmatpush.msk.msrb.mxu3 %vm1429_vm3, %v416_v49  ;;  %vm611_vm3 = vcmp.eq.s32.totalorder %v579_v46, %v1279_v27  ;;  %vm627_vm7 = vcmp.eq.s32.totalorder %v595_v47, %v1279_v27  ;;  %vm806_vm10 = vcmask 64512  }
 0x1fa   : > { %1103 = vmatmul.msk.f32.vlgmr.msrb.gmra.mxu2 %vm486_vm5, %v1515_v26  ;;  %1113 = vmatmul.msk.f32.vlgmr.msrb.gmra.mxu3 %vm486_vm5, %v1515_v26  ;;  %v593_v26 = vshra.s32 %v561_v53, 8 }
 0x1fb   : > { %1125 = vmatpush.msk.msra.mxu0 %vm611_vm3, %v1234_v52  ;;  %1141 = vmatpush.msk.msra.mxu1 %vm627_vm7, %v1234_v52 }
 0x1fc   : > { %vm625_vm4 = vcmp.eq.s32.totalorder %v593_v26, %v1279_v27  ;;  %797 = vmatpush.msra.mxu3 %v754_v19 }
 0x1fd   : > { %1126 = vmatpush.msk.msra.mxu0 %vm610_vm13, %v1234_v52  ;;  %1142 = vmatpush.msk.msra.mxu1 %vm626_vm0, %v1234_v52 }
 0x1fe   : > { %798 = vmatpush.msra.mxu3 %v753_v21 }
 0x1ff   : > { %1127 = vmatpush.msk.msra.mxu0 %vm609_vm2, %v1234_v52  ;;  %1143 = vmatpush.msk.msra.mxu1 %vm625_vm4, %v1234_v52  ;;  %v484_v8 = vpop.permute.xlu1 %483 }
 0x200   : > { %799 = vmatpush.msra.mxu3 %v752_v51 }
 0x201   : > { %1128 = vmatpush.msk.msra.mxu0 %vm608_vm12, %v1234_v52  ;;  %1144 = vmatpush.msk.msra.mxu1 %vm624_vm15, %v1234_v52 }
 0x202   : > { %1104 = vmatmul.msk.f32.gmra.mxu2 %vm486_vm5, %v1520_v30  ;;  %1114 = vmatmul.msk.f32.gmra.mxu3 %vm486_vm5, %v1520_v30  ;;  %v591_v30 = vshra.s32 %v559_v60, 8 }
 0x203   : > { %1129 = vmatpush.msk.msra.mxu0 %vm607_vm1, %v1234_v52  ;;  %800 = vmatpush.msra.mxu3 %v751_v24 }
 0x204   : > { %vm623_vm5 = vcmp.eq.s32.totalorder %v591_v30, %v1279_v27 }
 0x205   : > { %1145 = vmatpush.msk.msra.mxu1 %vm623_vm5, %v1234_v52  ;;  %1130 = vmatpush.msk.msra.mxu0 %vm606_vm6, %v1234_v52 }
 0x206   : > { %853 = vmatpush.msrb.mxu3 %v805_v25 }
 0x207   : > { %1146 = vmatpush.msk.msra.mxu1 %vm622_vm11, %v1234_v52  ;;  %v749_v52 = vld [vmem:[%s1845_s1 + $0x38] sm:$0xff] }
 0x208   : > { %774 = vmatpush.msra.mxu2 %v749_v52 }
 0x20a   : > { %775 = vmatpush.msra.mxu2 %v748_v14 }
 0x20c   : > { %825 = vmatpush.msrb.mxu2 %v805_v25 }
 0x27d   : > { %v508_v3 = vpop.f32.mrf.mxu2  ;;  %v531_v4 = vpop.f32.mrf.mxu3 }
 0x27e   : > { %v509_v5 = vadd.f32 %v508_v3, %v479_v2  ;;  %v532_v32 = vadd.f32 %v531_v4, %v479_v2 }
 0x280   : > { %v537_v6 = vmax.f32 %v509_v5, 0.0  ;;  %v538_v7 = vmax.f32 %v532_v32, 0.0 }
 0x282   : > { %686 = vmatmul.f32.vlgmr.msra.gmra.mxu0 %v537_v6  ;;  %709 = vmatmul.f32.vlgmr.msra.gmra.mxu1 %v538_v7 }
 0x285   : > { %v511_v9 = vpop.f32.mrf.mxu2  ;;  %v534_v10 = vpop.f32.mrf.mxu3 }
 0x286   : > { %v512_v11 = vadd.f32 %v511_v9, %v484_v8  ;;  %v535_v12 = vadd.f32 %v534_v10, %v484_v8 }
 0x288   : > { %v539_v13 = vmax.f32 %v512_v11, 0.0  ;;  %v540_v27 = vmax.f32 %v535_v12, 0.0 }
 0x28a   : > { %689 = vmatmul.f32.gmra.mxu0 %v539_v13  ;;  %712 = vmatmul.f32.gmra.mxu1 %v540_v27 }
 0x2ff   : > { %v687_v15 = vpop.f32.mrf.mxu0  ;;  %v710_v59 = vpop.f32.mrf.mxu1 }
 0x300   : > { %v711_v61 = vadd.f32 %v710_v59, %v687_v15 }
 0x302   : > { %716 = vxpose.xlu2.b32.start [1/2] (short) (narrow) %v711_v61, 8 }
 0x307   : > { %v690_v16 = vpop.f32.mrf.mxu0  ;;  %v713_v17 = vpop.f32.mrf.mxu1 }
 0x308   : > { %v714_v18 = vadd.f32 %v713_v17, %v690_v16 }
 0x30a   : > { %717 = vxpose.xlu2.b32.end [2/2] (short) (narrow) %v714_v18, 8 }
 0x39b   : > { %v732_v23 = vpop.trf.xlu2 }
 0x39c   : > { %1147 = vmatmul.msk.f32.vlgmr.msra.gmra.mxu2 %vm756_vm8, %v732_v23 }
 0x41f   : > { %v777_v22 = vpop.f32.mrf.mxu2 }
 0x420   : > { %v778_v28 = vadd.f32 %v777_v22, %v750_v56 }
 0x422   : > { %v780_v29 = vmax.f32 %v778_v28, 0.0 }
 0x424   : > { %1148 = vmatmul.msk.f32.vlgmr.msra.gmra.mxu3 %vm781_vm9, %v780_v29 }
 0x4a7   : > { %v802_v38 = vpop.f32.mrf.mxu3 }
 0x4a8   : > { %v803_v31 = vadd.f32 %v802_v38, %v755_v36 }
 0x4aa   : > { %834 = vrot.lane.b32.xlu1 %v803_v31, %s1235_s22  ;;  %1149 = vmatmul.msk.f32.vlgmr.msrb.gmra.mxu2 %vm806_vm10, %v803_v31 }
 0x51c   : > { %v835_v33 = vpop.permute.xlu1 %834 }
 0x51d   : > { %1150 = vmatmul.msk.f32.vlgmr.msrb.gmra.mxu3 %vm806_vm10, %v835_v33 }
 0x52d   : > { %v827_v35 = vpop.f32.mrf.mxu2 }
 0x52e   : > { %v828_v40 = vadd.f32 1.0, %v827_v35 }
 0x530   : > { %v830_v41 = vmul.f32 0.5, %v828_v40 }
 0x532   : > { %v831_v42 = vmul.f32 15.0, %v830_v41 }
 0x534   : > { %v832_v43 = vmax.f32 %v831_v42, 0.0 }
 0x536   : > { %v833_v45 = vmin.f32 %v832_v43, 15.0 }
 0x538   : > { %v862_v46 = vfloor.f32 %v833_v45 }
 0x53a   : > { %v1154_v49 = vcvt.f32.s32 %v862_v46  ;;  %v864_v44 = vsub.f32 %v833_v45, %v862_v46 }
 0x53c   : > { %v870_v37 = vadd.s32 1, %v1154_v49  ;;  %v866_v63 = vsub.f32 1.0, %v864_v44  ;;  %v876_v3 = vperm.slane %v1154_v49, 0  ;;  %v885_v32 = vperm.slane %v864_v44, 0 }
 0x53e   : > { %vm871_vm14 = vcmp.lt.s32.totalorder %v870_v37, 15  ;;  %v879_v5 = vperm.slane %v866_v63, 0  ;;  %vm878_vm15 = vcmp.eq.s32.totalorder %v1731_v58, %v876_v3  ;;  %vm877_vm1 = vcmp.eq.s32.totalorder %v1502_v20, %v876_v3 }
 0x53f   : > { %v872_v57 = vsel %vm871_vm14, %v870_v37, 15 }
 0x540   : > { %v882_v0 = vperm.slane %v872_v57, 0  ;;  %v881_v61 = vsel %vm878_vm15, %v879_v5, 0.0  ;;  %v880_v16 = vsel %vm877_vm1, %v879_v5, 0.0 }
 0x542   : > { %vm883_vm0 = vcmp.eq.s32.totalorder %v1502_v20, %v882_v0  ;;  %vm884_vm2 = vcmp.eq.s32.totalorder %v1731_v58, %v882_v0 }
 0x543   : > { %v886_v13 = vsel %vm883_vm0, %v885_v32, 0.0  ;;  %v887_v27 = vsel %vm884_vm2, %v885_v32, 0.0 }
 0x544   : > { %v1788_v17 = vadd.f32 %v887_v27, %v881_v61  ;;  %v1790_v19 = vadd.f32 %v886_v13, %v880_v16 }
 0x5a0   : > { %v855_v47 = vpop.f32.mrf.mxu3 }
 0x5a1   : > { %v856_v48 = vadd.f32 1.0, %v855_v47 }
 0x5a3   : > { %v858_v50 = vmul.f32 0.5, %v856_v48 }
 0x5a5   : > { %v859_v53 = vmul.f32 15.0, %v858_v50 }
 0x5a7   : > { %v860_v54 = vmax.f32 %v859_v53, 0.0 }
 0x5a9   : > { %v861_v39 = vmin.f32 %v860_v54, 15.0 }
 0x5ab   : > { %v863_v34 = vfloor.f32 %v861_v39 }
 0x5ad   : > { %v865_v26 = vsub.f32 %v861_v39, %v863_v34  ;;  %v1156_v55 = vcvt.f32.s32 %v863_v34 }
 0x5af   : > { %v867_v60 = vsub.f32 1.0, %v865_v26  ;;  %v873_v62 = vadd.s32 1, %v1156_v55  ;;  %v890_v30 = vperm.slane %v1156_v55, 0  ;;  %v899_v6 = vperm.slane %v865_v26, 0 }
 0x5b1   : > { %vm874_vm3 = vcmp.lt.s32.totalorder %v873_v62, 15  ;;  %v893_v2 = vperm.slane %v867_v60, 0  ;;  %vm891_vm7 = vcmp.eq.s32.totalorder %v1502_v20, %v890_v30  ;;  %vm892_vm13 = vcmp.eq.s32.totalorder %v1731_v58, %v890_v30 }
 0x5b2   : > { %v875_v1 = vsel %vm874_vm3, %v873_v62, 15 }
 0x5b3   : > { %v896_v4 = vperm.slane %v875_v1, 0  ;;  %v894_v7 = vsel %vm891_vm7, %v893_v2, 0.0  ;;  %v895_v8 = vsel %vm892_vm13, %v893_v2, 0.0 }
 0x5b5   : > { %vm897_vm4 = vcmp.eq.s32.totalorder %v1502_v20, %v896_v4  ;;  %vm898_vm12 = vcmp.eq.s32.totalorder %v1731_v58, %v896_v4 }
 0x5b6   : > { %v900_v9 = vsel %vm897_vm4, %v899_v6, 0.0  ;;  %v901_v10 = vsel %vm898_vm12, %v899_v6, 0.0 }
 0x5b7   : > { %v1779_v11 = vadd.f32 %v900_v9, %v894_v7  ;;  %v1781_v12 = vadd.f32 %v901_v10, %v895_v8 }
 0x5b9   : > { %v912_v52 = vrot.slane %v1779_v11, 7  ;;  %v919_v14 = vrot.slane %v1781_v12, 7  ;;  %v911_v15 = vrot.slane %v1779_v11, 6  ;;  %v918_v59 = vrot.slane %v1781_v12, 6 }
 0x5ba   : > { %v910_v20 = vrot.slane %v1779_v11, 5  ;;  %v917_v21 = vrot.slane %v1781_v12, 5  ;;  %v909_v29 = vrot.slane %v1779_v11, 4  ;;  %v916_v25 = vrot.slane %v1781_v12, 4 }
 0x5bb   : > { %v927_v58 = vperm.slane %v912_v52, 0  ;;  %v935_v18 = vperm.slane %v919_v14, 0  ;;  %v926_v24 = vperm.slane %v911_v15, 0  ;;  %v934_v56 = vperm.slane %v918_v59, 0 }
 0x5bc   : > { %v925_v31 = vperm.slane %v910_v20, 0  ;;  %v933_v33 = vperm.slane %v917_v21, 0  ;;  %v924_v41 = vperm.slane %v909_v29, 0  ;;  %v932_v42 = vperm.slane %v916_v25, 0 }
 0x5bd   : > { %v967_v51 = vmul.f32 %v927_v58, %v1788_v17  ;;  %v983_v23 = vmul.f32 %v935_v18, %v1788_v17  ;;  %v966_v22 = vmul.f32 %v927_v58, %v1790_v19  ;;  %v982_v28 = vmul.f32 %v935_v18, %v1790_v19  ;;  %v985_v15 = vld.sshfl [vmem:[#allocation1] sm:$0xff pattern:$0x75316420]  ;;  %v986_v59 = vld.sshfl [vmem:[#allocation1 + $0x8] sm:$0xff pattern:$0x75316420] }
 0x5be   : > { %v965_v36 = vmul.f32 %v926_v24, %v1788_v17  ;;  %v981_v38 = vmul.f32 %v934_v56, %v1788_v17  ;;  %v964_v35 = vmul.f32 %v926_v24, %v1790_v19  ;;  %v980_v40 = vmul.f32 %v934_v56, %v1790_v19 }
 0x5bf   : > { %989 = vmatpush.msrb.mxu0 %v967_v51  ;;  %1009 = vmatpush.msrb.mxu1 %v983_v23  ;;  %v963_v43 = vmul.f32 %v925_v31, %v1788_v17  ;;  %v979_v45 = vmul.f32 %v933_v33, %v1788_v17  ;;  %v908_v46 = vrot.slane %v1779_v11, 3  ;;  %v915_v47 = vrot.slane %v1781_v12, 3 }
 0x5c0   : > { %v962_v48 = vmul.f32 %v925_v31, %v1790_v19  ;;  %v978_v49 = vmul.f32 %v933_v33, %v1790_v19  ;;  %v961_v50 = vmul.f32 %v924_v41, %v1788_v17  ;;  %v977_v53 = vmul.f32 %v932_v42, %v1788_v17 }
 0x5c1   : > { %990 = vmatpush.msrb.mxu0 %v966_v22  ;;  %1010 = vmatpush.msrb.mxu1 %v982_v28  ;;  %v923_v37 = vperm.slane %v908_v46, 0  ;;  %v931_v54 = vperm.slane %v915_v47, 0  ;;  %v907_v39 = vrot.slane %v1779_v11, 2  ;;  %v914_v34 = vrot.slane %v1781_v12, 2 }
 0x5c2   : > { %v960_v44 = vmul.f32 %v924_v41, %v1790_v19  ;;  %v976_v26 = vmul.f32 %v932_v42, %v1790_v19  ;;  %v906_v55 = vrot.slane %v1779_v11, 1  ;;  %v913_v57 = vrot.slane %v1781_v12, 1 }
 0x5c3   : > { %991 = vmatpush.msrb.mxu0 %v965_v36  ;;  %1011 = vmatpush.msrb.mxu1 %v981_v38  ;;  %v959_v60 = vmul.f32 %v923_v37, %v1788_v17  ;;  %v975_v62 = vmul.f32 %v931_v54, %v1788_v17  ;;  %v922_v30 = vperm.slane %v907_v39, 0  ;;  %v930_v63 = vperm.slane %v914_v34, 0 }
 0x5c4   : > { %v958_v0 = vmul.f32 %v923_v37, %v1790_v19  ;;  %v974_v1 = vmul.f32 %v931_v54, %v1790_v19  ;;  %v921_v4 = vperm.slane %v906_v55, 0  ;;  %v929_v5 = vperm.slane %v913_v57, 0 }
 0x5c5   : > { %992 = vmatpush.msrb.mxu0 %v964_v35  ;;  %1012 = vmatpush.msrb.mxu1 %v980_v40  ;;  %v957_v2 = vmul.f32 %v922_v30, %v1788_v17  ;;  %v973_v3 = vmul.f32 %v930_v63, %v1788_v17  ;;  %v956_v32 = vmul.f32 %v922_v30, %v1790_v19  ;;  %v920_v9 = vperm.slane %v1779_v11, 0 }
 0x5c6   : > { %v972_v6 = vmul.f32 %v930_v63, %v1790_v19  ;;  %v955_v7 = vmul.f32 %v921_v4, %v1788_v17  ;;  %v971_v8 = vmul.f32 %v929_v5, %v1788_v17  ;;  %v928_v10 = vperm.slane %v1781_v12, 0 }
 0x5c7   : > { %993 = vmatpush.msrb.mxu0 %v963_v43  ;;  %1013 = vmatpush.msrb.mxu1 %v979_v45  ;;  %v954_v13 = vmul.f32 %v921_v4, %v1790_v19  ;;  %v970_v27 = vmul.f32 %v929_v5, %v1790_v19  ;;  %v953_v52 = vmul.f32 %v920_v9, %v1788_v17 }
 0x5c8   : > { %v969_v14 = vmul.f32 %v928_v10, %v1788_v17  ;;  %v952_v11 = vmul.f32 %v920_v9, %v1790_v19  ;;  %v968_v12 = vmul.f32 %v928_v10, %v1790_v19 }
 0x5c9   : > { %994 = vmatpush.msrb.mxu0 %v962_v48  ;;  %1014 = vmatpush.msrb.mxu1 %v978_v49 }
 0x5cb   : > { %995 = vmatpush.msrb.mxu0 %v961_v50  ;;  %1015 = vmatpush.msrb.mxu1 %v977_v53 }
 0x5cd   : > { %996 = vmatpush.msrb.mxu0 %v960_v44  ;;  %1016 = vmatpush.msrb.mxu1 %v976_v26 }
 0x5cf   : > { %997 = vmatpush.msrb.mxu0 %v959_v60  ;;  %1017 = vmatpush.msrb.mxu1 %v975_v62 }
 0x5d1   : > { %998 = vmatpush.msrb.mxu0 %v958_v0  ;;  %1018 = vmatpush.msrb.mxu1 %v974_v1 }
 0x5d3   : > { %999 = vmatpush.msrb.mxu0 %v957_v2  ;;  %1019 = vmatpush.msrb.mxu1 %v973_v3 }
 0x5d5   : > { %1000 = vmatpush.msrb.mxu0 %v956_v32  ;;  %1020 = vmatpush.msrb.mxu1 %v972_v6 }
 0x5d7   : > { %1001 = vmatpush.msrb.mxu0 %v955_v7  ;;  %1021 = vmatpush.msrb.mxu1 %v971_v8 }
 0x5d9   : > { %1002 = vmatpush.msrb.mxu0 %v954_v13  ;;  %1022 = vmatpush.msrb.mxu1 %v970_v27 }
 0x5db   : > { %1003 = vmatpush.msrb.mxu0 %v953_v52  ;;  %1023 = vmatpush.msrb.mxu1 %v969_v14 }
 0x5dd   : > { %1004 = vmatpush.msrb.mxu0 %v952_v11  ;;  %1024 = vmatpush.msrb.mxu1 %v968_v12 }
 0x5de   : > { %1005 = vmatmul.f32.vlgmr.msrb.gmra.mxu0 %v985_v15  ;;  %1025 = vmatmul.f32.vlgmr.msrb.gmra.mxu1 %v986_v59 }
 0x65b   : > { %v1006_v61 = vpop.f32.mrf.mxu0  ;;  %v1026_v16 = vpop.f32.mrf.mxu1 }
 0x65c   : > { %v1027_v17 = vadd.f32 %v1026_v16, %v1006_v61 }
 0x65e   : > { %1029 = vst [vmem:[%s143_s26] sm:$0xf] %v1027_v17 }
 0x65f PF: > { %s12_s9 = sadd.s32 1, %s1222_s9  }
 0x660   : > { %p9_p5 = scmp.ge.s32.totalorder %s12_s9, 4  }
 0x662   :  { %11 = sbr.rel (!%p9_p5) target bundleno = 1 (0x1), region = 58 }

</bundles_post_ra>
